<compile_context>
chip_gen: v6e
topology: v6e:2x2x1
jax: 0.10.0
libtpu: 0.0.40
codegen_flags: <defaults>
</compile_context>

<pallas_src>
import functools

import jax
import jax.numpy as jnp
from jax import lax
from jax.experimental import pallas as pl
from jax.experimental.pallas import tpu as pltpu


# ----------------------------------------------------------------------------
# Fused RCAB kernel: one batch *tile* per grid step, everything in VMEM.
# ----------------------------------------------------------------------------
def _rcab_kernel(x_ref, band1_ref, bias1_ref, band2_ref, bias2_ref,
                 pw1_ref, b1_ref, w2t_ref, b2t_ref, o_ref, pad_ref,
                 *, B, H, W, C):
    # x_ref, o_ref : (B, H, W*C) f32   activations, lane-dense folded layout
    # bandK_ref    : (3, W*C, W*C) bf16 block-banded 3x3 conv weights (per dy)
    # biasK_ref    : (1, W*C) f32     conv bias tiled W times along lanes
    # pw1_ref      : (W*C, Cr) f32    CA 1x1 conv #1, mean-pool folded in
    # b1_ref       : (1, Cr)  f32
    # w2t_ref      : (Cr, W*C) f32    CA 1x1 conv #2, tiled W times
    # b2t_ref      : (1, W*C) f32
    # pad_ref      : (B*(H+2), W*C) bf16  stacked, H-zero-padded conv input;
    #                the zero halo rows double as inter-image separators.
    WC = W * C
    S = H + 2                 # per-image row stride in the stacked pad buffer
    M = B * S                 # total padded rows

    # Zero only the halo/separator rows every step (2 rows per image; tiny).
    # Not gated on program_id == 0: with megacore "parallel" sharding each
    # TensorCore has its own scratch and may never execute step 0.
    zrow = jnp.zeros((1, WC), jnp.bfloat16)
    for b in range(B):
        pad_ref[b * S:b * S + 1, :] = zrow
        pad_ref[b * S + H + 1:b * S + H + 2, :] = zrow

    # Stack the B images into the pad scratch (bf16 for the MXU).
    for b in range(B):
        pad_ref[b * S + 1:b * S + 1 + H, :] = x_ref[b].astype(jnp.bfloat16)

    def banded_conv(band_ref):
        # Row k of the result corresponds to padded row k+1.
        acc = jnp.dot(pad_ref[0:M - 2, :], band_ref[0],
                      preferred_element_type=jnp.float32)
        acc += jnp.dot(pad_ref[1:M - 1, :], band_ref[1],
                       preferred_element_type=jnp.float32)
        acc += jnp.dot(pad_ref[2:M, :], band_ref[2],
                       preferred_element_type=jnp.float32)
        return acc                                       # (M-2, W*C) f32

    # ---- conv1 + bias + ReLU (f32 element-wise), write back into the SAME
    # pad scratch as the conv2 input (halo rows stay zero). -------------------
    acc1 = jnp.maximum(banded_conv(band1_ref) + bias1_ref[...], 0.0)
    for b in range(B):
        pad_ref[b * S + 1:b * S + 1 + H, :] = (
            acc1[b * S:b * S + H].astype(jnp.bfloat16))

    # ---- conv2 + bias --------------------------------------------------------
    acc2 = banded_conv(band2_ref) + bias2_ref[...]       # (M-2, W*C) f32
    # TODO(synk): if the stacked M grows far beyond ~64 rows, accumulate
    # acc1/acc2 in VMEM scratch (or tile H via a grid axis) to avoid spills.

    # ---- channel attention: per-image pool -> FC -> ReLU -> FC -> sigmoid ---
    pooled = jnp.concatenate(
        [jnp.sum(acc2[b * S:b * S + H], axis=0, keepdims=True)
         for b in range(B)], axis=0)                     # (B, W*C)
    z = jnp.maximum(
        jnp.dot(pooled, pw1_ref[...], preferred_element_type=jnp.float32)
        + b1_ref[...], 0.0)                              # (B, Cr)
    s = jax.nn.sigmoid(
        jnp.dot(z, w2t_ref[...], preferred_element_type=jnp.float32)
        + b2t_ref[...])                                  # (B, W*C), tiled

    # ---- scale + residual + lane-dense store (all f32) -----------------------
    for b in range(B):
        o_ref[b] = (acc2[b * S:b * S + H] * s[b:b + 1, :]
                    + x_ref[b]).astype(o_ref.dtype)


# ----------------------------------------------------------------------------
# Wrapper-side weight preparation.
# ----------------------------------------------------------------------------
def _band_from_hwio(w_hwio, W):
    """Block-banded conv weights.

    Returns band of shape (3, W*Cin, W*Cout) with
      band[dy, wi*Cin + ci, wo*Cout + co] = w_hwio[dy, wi - wo + 1, ci, co]
    (zero where the width tap falls outside the 3x3 kernel), so that for an
    H-zero-padded, (*, W*Cin)-folded input `p`:
      conv3x3_same(x)[h, :] = sum_dy p[h + dy, :] @ band[dy].
    Width zero-padding is implicit in the band structure.
    """
    KH, KW, Cin, Cout = w_hwio.shape
    wi = jnp.arange(W)[:, None]
    wo = jnp.arange(W)[None, :]
    dx = wi - wo + 1                                        # (W, W)
    valid = ((dx >= 0) & (dx < KW)).astype(w_hwio.dtype)
    taps = w_hwio[:, jnp.clip(dx, 0, KW - 1)]               # (KH, W, W, Cin, Cout)
    taps = taps * valid[None, :, :, None, None]
    band = jnp.transpose(taps, (0, 1, 3, 2, 4))             # (dy, wi, Cin, wo, Cout)
    return band.reshape(KH, W * Cin, W * Cout)


def _pick_batch_tile(N, H, rows_target=256):
    """Largest divisor of N whose stacked padded height stays <= rows_target."""
    best = 1
    for b in range(1, N + 1):
        if N % b == 0 and b * (H + 2) <= rows_target:
            best = b
    return best


@jax.jit
def rcab_forward_folded(x_fold, params):
    """RCAB on the folded lane-dense layout (N, H, W*C), f32 in / f32 out.

    Preferred entry point when chaining RCABs: no NCHW<->NHWC relayout
    between blocks (those transposes cost more HBM traffic than the kernel
    itself at small sizes).
    """
    N, H, WC = x_fold.shape
    C = params["conv1_b"].shape[0]
    W = WC // C
    Cr = params["ca_w1"].shape[-1]
    B_tile = _pick_batch_tile(N, H)

    x = x_fold.astype(jnp.float32)

    # Pre-arranged weights (tiny; constant-folded under jit).  Conv bands are
    # stored bf16 (MXU-rate + VMEM win); accumulation / element-wise stay f32.
    band1 = _band_from_hwio(params["conv1_w"].astype(jnp.float32), W).astype(jnp.bfloat16)
    band2 = _band_from_hwio(params["conv2_w"].astype(jnp.float32), W).astype(jnp.bfloat16)
    bias1 = jnp.tile(params["conv1_b"].reshape(1, C), (1, W)).astype(jnp.float32)
    bias2 = jnp.tile(params["conv2_b"].reshape(1, C), (1, W)).astype(jnp.float32)
    pw1 = (jnp.tile(params["ca_w1"], (W, 1)) / float(H * W)).astype(jnp.float32)
    b1 = params["ca_b1"].reshape(1, Cr).astype(jnp.float32)
    w2t = jnp.tile(params["ca_w2"], (1, W)).astype(jnp.float32)          # (Cr, W*C)
    b2t = jnp.tile(params["ca_b2"].reshape(1, C), (1, W)).astype(jnp.float32)

    kernel = functools.partial(_rcab_kernel, B=B_tile, H=H, W=W, C=C)

    def _const2(n):
        return (0, 0)

    def _const3(n):
        return (0, 0, 0)

    # Constant operands: constant index_map => already DMA'd once; Buffered(1)
    # drops the second (useless) buffer to save VMEM headroom.
    wspec = functools.partial(pl.BlockSpec, pipeline_mode=pl.Buffered(1))

    out = pl.pallas_call(
        kernel,
        out_shape=jax.ShapeDtypeStruct((N, H, WC), jnp.float32),
        grid_spec=pltpu.PrefetchScalarGridSpec(
            num_scalar_prefetch=0,
            grid=(N // B_tile,),
            in_specs=[
                pl.BlockSpec((B_tile, H, WC), lambda n: (n, 0, 0)),   # x
                wspec((3, WC, WC), _const3),                          # band1
                wspec((1, WC), _const2),                              # bias1
                wspec((3, WC, WC), _const3),                          # band2
                wspec((1, WC), _const2),                              # bias2
                wspec((WC, Cr), _const2),                             # pw1
                wspec((1, Cr), _const2),                              # b1
                wspec((Cr, WC), _const2),                             # w2t
                wspec((1, WC), _const2),                              # b2t
            ],
            out_specs=pl.BlockSpec((B_tile, H, WC), lambda n: (n, 0, 0)),
            scratch_shapes=[
                pltpu.VMEM((B_tile * (H + 2), WC), jnp.bfloat16),     # stacked pad
            ],
        ),
        compiler_params=pltpu.CompilerParams(
            dimension_semantics=("parallel",),
        ),
    )(x, band1, bias1, band2, bias2, pw1, b1, w2t, b2t)
    return out


@jax.jit
def rcab_forward(x_nchw, params):
    """NCHW-in / NCHW-out wrapper matching the PyTorch module interface.

    For chained RCABs use rcab_forward_folded directly and skip the relayout.
    """
    N, C, H, W = x_nchw.shape
    x_fold = jnp.transpose(x_nchw, (0, 2, 3, 1)).reshape(N, H, W * C)
    out = rcab_forward_folded(x_fold, params)
    return jnp.transpose(out.reshape(N, H, W, C), (0, 3, 1, 2))


# ----------------------------------------------------------------------------
# Pure-JAX f32 reference for verification.
# ----------------------------------------------------------------------------
def rcab_reference(x_nchw, params):
    x = jnp.transpose(x_nchw, (0, 2, 3, 1)).astype(jnp.float32)
    dn = ("NHWC", "HWIO", "NHWC")
    h = lax.conv_general_dilated(x, params["conv1_w"], (1, 1), "SAME",
                                 dimension_numbers=dn) + params["conv1_b"]
    h = jnp.maximum(h, 0.0)
    h = lax.conv_general_dilated(h, params["conv2_w"], (1, 1), "SAME",
                                 dimension_numbers=dn) + params["conv2_b"]
    y = jnp.mean(h, axis=(1, 2))                                  # (N, C)
    z = jnp.maximum(y @ params["ca_w1"] + params["ca_b1"], 0.0)
    s = jax.nn.sigmoid(z @ params["ca_w2"] + params["ca_b2"])     # (N, C)
    out = h * s[:, None, None, :] + x
    return jnp.transpose(out, (0, 3, 1, 2))


def init_params(key, n_feat, reduction):
    ks = jax.random.split(key, 8)
    c_red = n_feat // reduction
    scale = 0.1
    return {
        "conv1_w": scale * jax.random.normal(ks[0], (3, 3, n_feat, n_feat), jnp.float32),
        "conv1_b": scale * jax.random.normal(ks[1], (n_feat,), jnp.float32),
        "conv2_w": scale * jax.random.normal(ks[2], (3, 3, n_feat, n_feat), jnp.float32),
        "conv2_b": scale * jax.random.normal(ks[3], (n_feat,), jnp.float32),
        "ca_w1": scale * jax.random.normal(ks[4], (n_feat, c_red), jnp.float32),
        "ca_b1": scale * jax.random.normal(ks[5], (c_red,), jnp.float32),
        "ca_w2": scale * jax.random.normal(ks[6], (c_red, n_feat), jnp.float32),
        "ca_b2": scale * jax.random.normal(ks[7], (n_feat,), jnp.float32),
    }


if __name__ == "__main__":
    N, C, H, W = 2, 16, 16, 16      # n_feat = 16, W*C = 256 (lane-dense)
    reduction = 4                   # n_feat // reduction = 4

    key = jax.random.PRNGKey(0)
    kx, kp = jax.random.split(key)
    x = jax.random.normal(kx, (N, C, H, W), jnp.float32)
    params = init_params(kp, C, reduction)

    out = jax.block_until_ready(rcab_forward(x, params))
    ref = jax.block_until_ready(rcab_reference(x, params))

    assert out.shape == (N, C, H, W)
    max_err = float(jnp.max(jnp.abs(out - ref)))
    # bf16 conv operands (f32 accumulation, f32 residual path) => a few 1e-2
    # absolute error at these magnitudes vs. the pure-f32 reference.
    assert max_err < 8e-2, max_err
    print("KERNEL_OK")
</pallas_src>

<mosaic_0001>
module attributes {stable_mosaic.version = 11 : i64} {
  func.func @_rcab_kernel(%arg0: i32, %arg1: memref<2x16x256xf32, #tpu.memory_space<vmem>>, %arg2: memref<3x256x256xbf16, #tpu.memory_space<vmem>>, %arg3: memref<1x256xf32, #tpu.memory_space<vmem>>, %arg4: memref<3x256x256xbf16, #tpu.memory_space<vmem>>, %arg5: memref<1x256xf32, #tpu.memory_space<vmem>>, %arg6: memref<256x4xf32, #tpu.memory_space<vmem>>, %arg7: memref<1x4xf32, #tpu.memory_space<vmem>>, %arg8: memref<4x256xf32, #tpu.memory_space<vmem>>, %arg9: memref<1x256xf32, #tpu.memory_space<vmem>>, %arg10: memref<2x16x256xf32, #tpu.memory_space<vmem>>, %arg11: memref<36x256xbf16, #tpu.memory_space<vmem>>) attributes {dimension_semantics = [#tpu.dimension_semantics<parallel>], iteration_bounds = array<i64: 1>, scalar_prefetch = 0 : i64, scratch_operands = 1 : i64, tpu.core_type = #tpu.core_type<tc>, window_params = [{transform_indices = @transform_0, window_bounds = array<i64: 2, 16, 256>}, {pipeline_mode = #tpu.pipeline_mode<synchronous>, transform_indices = @transform_1, window_bounds = array<i64: 3, 256, 256>}, {pipeline_mode = #tpu.pipeline_mode<synchronous>, transform_indices = @transform_2, window_bounds = array<i64: 1, 256>}, {pipeline_mode = #tpu.pipeline_mode<synchronous>, transform_indices = @transform_3, window_bounds = array<i64: 3, 256, 256>}, {pipeline_mode = #tpu.pipeline_mode<synchronous>, transform_indices = @transform_4, window_bounds = array<i64: 1, 256>}, {pipeline_mode = #tpu.pipeline_mode<synchronous>, transform_indices = @transform_5, window_bounds = array<i64: 256, 4>}, {pipeline_mode = #tpu.pipeline_mode<synchronous>, transform_indices = @transform_6, window_bounds = array<i64: 1, 4>}, {pipeline_mode = #tpu.pipeline_mode<synchronous>, transform_indices = @transform_7, window_bounds = array<i64: 4, 256>}, {pipeline_mode = #tpu.pipeline_mode<synchronous>, transform_indices = @transform_8, window_bounds = array<i64: 1, 256>}, {transform_indices = @transform_9, window_bounds = array<i64: 2, 16, 256>}]} {
    %cst = arith.constant 0.000000e+00 : bf16
    %0 = vector.broadcast %cst : bf16 to vector<1x256xbf16>
    %c0 = arith.constant 0 : index
    %c0_0 = arith.constant 0 : index
    %1 = vector.load %arg11[%c0, %c0_0] : memref<36x256xbf16, #tpu.memory_space<vmem>>, vector<1x256xbf16>
    tpu.vector_store %arg11[%c0, %c0_0], %0 {strides = array<i32>} : memref<36x256xbf16, #tpu.memory_space<vmem>>, vector<1x256xbf16>,
    %c17 = arith.constant 17 : index
    %c0_1 = arith.constant 0 : index
    %2 = vector.load %arg11[%c17, %c0_1] : memref<36x256xbf16, #tpu.memory_space<vmem>>, vector<1x256xbf16>
    tpu.vector_store %arg11[%c17, %c0_1], %0 {strides = array<i32>} : memref<36x256xbf16, #tpu.memory_space<vmem>>, vector<1x256xbf16>,
    %c18 = arith.constant 18 : index
    %c0_2 = arith.constant 0 : index
    %3 = vector.load %arg11[%c18, %c0_2] : memref<36x256xbf16, #tpu.memory_space<vmem>>, vector<1x256xbf16>
    tpu.vector_store %arg11[%c18, %c0_2], %0 {strides = array<i32>} : memref<36x256xbf16, #tpu.memory_space<vmem>>, vector<1x256xbf16>,
    %c35 = arith.constant 35 : index
    %c0_3 = arith.constant 0 : index
    %4 = vector.load %arg11[%c35, %c0_3] : memref<36x256xbf16, #tpu.memory_space<vmem>>, vector<1x256xbf16>
    tpu.vector_store %arg11[%c35, %c0_3], %0 {strides = array<i32>} : memref<36x256xbf16, #tpu.memory_space<vmem>>, vector<1x256xbf16>,
    %c0_4 = arith.constant 0 : index
    %c0_5 = arith.constant 0 : index
    %c0_6 = arith.constant 0 : index
    %5 = vector.load %arg1[%c0_4, %c0_5, %c0_6] : memref<2x16x256xf32, #tpu.memory_space<vmem>>, vector<1x16x256xf32>
    %6 = vector.shape_cast %5 : vector<1x16x256xf32> to vector<16x256xf32>
    %7 = arith.truncf %6 : vector<16x256xf32> to vector<16x256xbf16>
    %c1 = arith.constant 1 : index
    %c0_7 = arith.constant 0 : index
    %8 = vector.load %arg11[%c1, %c0_7] : memref<36x256xbf16, #tpu.memory_space<vmem>>, vector<16x256xbf16>
    tpu.vector_store %arg11[%c1, %c0_7], %7 {strides = array<i32>} : memref<36x256xbf16, #tpu.memory_space<vmem>>, vector<16x256xbf16>,
    %c1_8 = arith.constant 1 : index
    %c0_9 = arith.constant 0 : index
    %c0_10 = arith.constant 0 : index
    %9 = vector.load %arg1[%c1_8, %c0_9, %c0_10] : memref<2x16x256xf32, #tpu.memory_space<vmem>>, vector<1x16x256xf32>
    %10 = vector.shape_cast %9 : vector<1x16x256xf32> to vector<16x256xf32>
    %11 = arith.truncf %10 : vector<16x256xf32> to vector<16x256xbf16>
    %c19 = arith.constant 19 : index
    %c0_11 = arith.constant 0 : index
    %12 = vector.load %arg11[%c19, %c0_11] : memref<36x256xbf16, #tpu.memory_space<vmem>>, vector<16x256xbf16>
    tpu.vector_store %arg11[%c19, %c0_11], %11 {strides = array<i32>} : memref<36x256xbf16, #tpu.memory_space<vmem>>, vector<16x256xbf16>,
    %c0_12 = arith.constant 0 : index
    %c0_13 = arith.constant 0 : index
    %13 = vector.load %arg11[%c0_12, %c0_13] : memref<36x256xbf16, #tpu.memory_space<vmem>>, vector<34x256xbf16>
    %c0_14 = arith.constant 0 : index
    %c0_15 = arith.constant 0 : index
    %c0_16 = arith.constant 0 : index
    %14 = vector.load %arg2[%c0_14, %c0_15, %c0_16] : memref<3x256x256xbf16, #tpu.memory_space<vmem>>, vector<1x256x256xbf16>
    %15 = vector.shape_cast %14 : vector<1x256x256xbf16> to vector<256x256xbf16>
    %cst_17 = arith.constant dense<0.000000e+00> : vector<34x256xf32>
    %16 = tpu.matmul %13, %15, %cst_17 {dimension_numbers = #tpu.dot_dimension_numbers<[1], [0], [0], [1], [0, 0, 1, 1], [], []>} : vector<34x256xbf16>, vector<256x256xbf16>, vector<34x256xf32> -> vector<34x256xf32>
    %c1_18 = arith.constant 1 : index
    %c0_19 = arith.constant 0 : index
    %17 = vector.load %arg11[%c1_18, %c0_19] : memref<36x256xbf16, #tpu.memory_space<vmem>>, vector<34x256xbf16>
    %c1_20 = arith.constant 1 : index
    %c0_21 = arith.constant 0 : index
    %c0_22 = arith.constant 0 : index
    %18 = vector.load %arg2[%c1_20, %c0_21, %c0_22] : memref<3x256x256xbf16, #tpu.memory_space<vmem>>, vector<1x256x256xbf16>
    %19 = vector.shape_cast %18 : vector<1x256x256xbf16> to vector<256x256xbf16>
    %cst_23 = arith.constant dense<0.000000e+00> : vector<34x256xf32>
    %20 = tpu.matmul %17, %19, %cst_23 {dimension_numbers = #tpu.dot_dimension_numbers<[1], [0], [0], [1], [0, 0, 1, 1], [], []>} : vector<34x256xbf16>, vector<256x256xbf16>, vector<34x256xf32> -> vector<34x256xf32>
    %21 = arith.addf %16, %20 : vector<34x256xf32>
    %c2 = arith.constant 2 : index
    %c0_24 = arith.constant 0 : index
    %22 = vector.load %arg11[%c2, %c0_24] : memref<36x256xbf16, #tpu.memory_space<vmem>>, vector<34x256xbf16>
    %c2_25 = arith.constant 2 : index
    %c0_26 = arith.constant 0 : index
    %c0_27 = arith.constant 0 : index
    %23 = vector.load %arg2[%c2_25, %c0_26, %c0_27] : memref<3x256x256xbf16, #tpu.memory_space<vmem>>, vector<1x256x256xbf16>
    %24 = vector.shape_cast %23 : vector<1x256x256xbf16> to vector<256x256xbf16>
    %cst_28 = arith.constant dense<0.000000e+00> : vector<34x256xf32>
    %25 = tpu.matmul %22, %24, %cst_28 {dimension_numbers = #tpu.dot_dimension_numbers<[1], [0], [0], [1], [0, 0, 1, 1], [], []>} : vector<34x256xbf16>, vector<256x256xbf16>, vector<34x256xf32> -> vector<34x256xf32>
    %26 = arith.addf %21, %25 : vector<34x256xf32>
    %c0_29 = arith.constant 0 : index
    %c0_30 = arith.constant 0 : index
    %27 = vector.load %arg3[%c0_29, %c0_30] : memref<1x256xf32, #tpu.memory_space<vmem>>, vector<1x256xf32>
    %28 = vector.broadcast %27 : vector<1x256xf32> to vector<34x256xf32>
    %29 = arith.addf %26, %28 : vector<34x256xf32>
    %cst_31 = arith.constant 0.000000e+00 : f32
    %30 = vector.broadcast %cst_31 : f32 to vector<34x256xf32>
    %31 = arith.maximumf %29, %30 : vector<34x256xf32>
    %32 = vector.extract_strided_slice %31 {offsets = [0, 0], sizes = [16, 256], strides = [1, 1]} : vector<34x256xf32> to vector<16x256xf32>
    %33 = arith.truncf %32 : vector<16x256xf32> to vector<16x256xbf16>
    %c1_32 = arith.constant 1 : index
    %c0_33 = arith.constant 0 : index
    %34 = vector.load %arg11[%c1_32, %c0_33] : memref<36x256xbf16, #tpu.memory_space<vmem>>, vector<16x256xbf16>
    tpu.vector_store %arg11[%c1_32, %c0_33], %33 {strides = array<i32>} : memref<36x256xbf16, #tpu.memory_space<vmem>>, vector<16x256xbf16>,
    %35 = vector.extract_strided_slice %31 {offsets = [18, 0], sizes = [16, 256], strides = [1, 1]} : vector<34x256xf32> to vector<16x256xf32>
    %36 = arith.truncf %35 : vector<16x256xf32> to vector<16x256xbf16>
    %c19_34 = arith.constant 19 : index
    %c0_35 = arith.constant 0 : index
    %37 = vector.load %arg11[%c19_34, %c0_35] : memref<36x256xbf16, #tpu.memory_space<vmem>>, vector<16x256xbf16>
    tpu.vector_store %arg11[%c19_34, %c0_35], %36 {strides = array<i32>} : memref<36x256xbf16, #tpu.memory_space<vmem>>, vector<16x256xbf16>,
    %c0_36 = arith.constant 0 : index
    %c0_37 = arith.constant 0 : index
    %38 = vector.load %arg11[%c0_36, %c0_37] : memref<36x256xbf16, #tpu.memory_space<vmem>>, vector<34x256xbf16>
    %c0_38 = arith.constant 0 : index
    %c0_39 = arith.constant 0 : index
    %c0_40 = arith.constant 0 : index
    %39 = vector.load %arg4[%c0_38, %c0_39, %c0_40] : memref<3x256x256xbf16, #tpu.memory_space<vmem>>, vector<1x256x256xbf16>
    %40 = vector.shape_cast %39 : vector<1x256x256xbf16> to vector<256x256xbf16>
    %cst_41 = arith.constant dense<0.000000e+00> : vector<34x256xf32>
    %41 = tpu.matmul %38, %40, %cst_41 {dimension_numbers = #tpu.dot_dimension_numbers<[1], [0], [0], [1], [0, 0, 1, 1], [], []>} : vector<34x256xbf16>, vector<256x256xbf16>, vector<34x256xf32> -> vector<34x256xf32>
    %c1_42 = arith.constant 1 : index
    %c0_43 = arith.constant 0 : index
    %42 = vector.load %arg11[%c1_42, %c0_43] : memref<36x256xbf16, #tpu.memory_space<vmem>>, vector<34x256xbf16>
    %c1_44 = arith.constant 1 : index
    %c0_45 = arith.constant 0 : index
    %c0_46 = arith.constant 0 : index
    %43 = vector.load %arg4[%c1_44, %c0_45, %c0_46] : memref<3x256x256xbf16, #tpu.memory_space<vmem>>, vector<1x256x256xbf16>
    %44 = vector.shape_cast %43 : vector<1x256x256xbf16> to vector<256x256xbf16>
    %cst_47 = arith.constant dense<0.000000e+00> : vector<34x256xf32>
    %45 = tpu.matmul %42, %44, %cst_47 {dimension_numbers = #tpu.dot_dimension_numbers<[1], [0], [0], [1], [0, 0, 1, 1], [], []>} : vector<34x256xbf16>, vector<256x256xbf16>, vector<34x256xf32> -> vector<34x256xf32>
    %46 = arith.addf %41, %45 : vector<34x256xf32>
    %c2_48 = arith.constant 2 : index
    %c0_49 = arith.constant 0 : index
    %47 = vector.load %arg11[%c2_48, %c0_49] : memref<36x256xbf16, #tpu.memory_space<vmem>>, vector<34x256xbf16>
    %c2_50 = arith.constant 2 : index
    %c0_51 = arith.constant 0 : index
    %c0_52 = arith.constant 0 : index
    %48 = vector.load %arg4[%c2_50, %c0_51, %c0_52] : memref<3x256x256xbf16, #tpu.memory_space<vmem>>, vector<1x256x256xbf16>
    %49 = vector.shape_cast %48 : vector<1x256x256xbf16> to vector<256x256xbf16>
    %cst_53 = arith.constant dense<0.000000e+00> : vector<34x256xf32>
    %50 = tpu.matmul %47, %49, %cst_53 {dimension_numbers = #tpu.dot_dimension_numbers<[1], [0], [0], [1], [0, 0, 1, 1], [], []>} : vector<34x256xbf16>, vector<256x256xbf16>, vector<34x256xf32> -> vector<34x256xf32>
    %51 = arith.addf %46, %50 : vector<34x256xf32>
    %c0_54 = arith.constant 0 : index
    %c0_55 = arith.constant 0 : index
    %52 = vector.load %arg5[%c0_54, %c0_55] : memref<1x256xf32, #tpu.memory_space<vmem>>, vector<1x256xf32>
    %53 = vector.broadcast %52 : vector<1x256xf32> to vector<34x256xf32>
    %54 = arith.addf %51, %53 : vector<34x256xf32>
    %55 = vector.extract_strided_slice %54 {offsets = [0, 0], sizes = [16, 256], strides = [1, 1]} : vector<34x256xf32> to vector<16x256xf32>
    %cst_56 = arith.constant dense<0.000000e+00> : vector<256xf32>
    %56 = vector.multi_reduction <add>, %55, %cst_56 [0] : vector<16x256xf32> to vector<256xf32>
    %57 = vector.shape_cast %56 : vector<256xf32> to vector<1x256xf32>
    %58 = vector.extract_strided_slice %54 {offsets = [18, 0], sizes = [16, 256], strides = [1, 1]} : vector<34x256xf32> to vector<16x256xf32>
    %cst_57 = arith.constant dense<0.000000e+00> : vector<256xf32>
    %59 = vector.multi_reduction <add>, %58, %cst_57 [0] : vector<16x256xf32> to vector<256xf32>
    %60 = vector.shape_cast %59 : vector<256xf32> to vector<1x256xf32>
    %61 = tpu.concatenate %57, %60 in 0 : vector<1x256xf32>, vector<1x256xf32> -> vector<2x256xf32>
    %c0_58 = arith.constant 0 : index
    %c0_59 = arith.constant 0 : index
    %62 = vector.load %arg6[%c0_58, %c0_59] : memref<256x4xf32, #tpu.memory_space<vmem>>, vector<256x4xf32>
    %cst_60 = arith.constant dense<0.000000e+00> : vector<2x4xf32>
    %63 = tpu.matmul %61, %62, %cst_60 {dimension_numbers = #tpu.dot_dimension_numbers<[1], [0], [0], [1], [0, 0, 1, 1], [], []>} : vector<2x256xf32>, vector<256x4xf32>, vector<2x4xf32> -> vector<2x4xf32>
    %c0_61 = arith.constant 0 : index
    %c0_62 = arith.constant 0 : index
    %64 = vector.load %arg7[%c0_61, %c0_62] : memref<1x4xf32, #tpu.memory_space<vmem>>, vector<1x4xf32>
    %65 = vector.broadcast %64 : vector<1x4xf32> to vector<2x4xf32>
    %66 = arith.addf %63, %65 : vector<2x4xf32>
    %cst_63 = arith.constant 0.000000e+00 : f32
    %67 = vector.broadcast %cst_63 : f32 to vector<2x4xf32>
    %68 = arith.maximumf %66, %67 : vector<2x4xf32>
    %c0_64 = arith.constant 0 : index
    %c0_65 = arith.constant 0 : index
    %69 = vector.load %arg8[%c0_64, %c0_65] : memref<4x256xf32, #tpu.memory_space<vmem>>, vector<4x256xf32>
    %cst_66 = arith.constant dense<0.000000e+00> : vector<2x256xf32>
    %70 = tpu.matmul %68, %69, %cst_66 {dimension_numbers = #tpu.dot_dimension_numbers<[1], [0], [0], [1], [0, 0, 1, 1], [], []>} : vector<2x4xf32>, vector<4x256xf32>, vector<2x256xf32> -> vector<2x256xf32>
    %c0_67 = arith.constant 0 : index
    %c0_68 = arith.constant 0 : index
    %71 = vector.load %arg9[%c0_67, %c0_68] : memref<1x256xf32, #tpu.memory_space<vmem>>, vector<1x256xf32>
    %72 = vector.broadcast %71 : vector<1x256xf32> to vector<2x256xf32>
    %73 = arith.addf %70, %72 : vector<2x256xf32>
    %74 = arith.negf %73 : vector<2x256xf32>
    %75 = math.exp %74 : vector<2x256xf32>
    %cst_69 = arith.constant 1.000000e+00 : f32
    %76 = vector.broadcast %cst_69 : f32 to vector<2x256xf32>
    %77 = arith.addf %76, %75 : vector<2x256xf32>
    %78 = arith.divf %76, %77 : vector<2x256xf32>
    %79 = vector.extract_strided_slice %54 {offsets = [0, 0], sizes = [16, 256], strides = [1, 1]} : vector<34x256xf32> to vector<16x256xf32>
    %80 = vector.extract_strided_slice %78 {offsets = [0, 0], sizes = [1, 256], strides = [1, 1]} : vector<2x256xf32> to vector<1x256xf32>
    %81 = vector.broadcast %80 : vector<1x256xf32> to vector<16x256xf32>
    %82 = arith.mulf %79, %81 : vector<16x256xf32>
    %c0_70 = arith.constant 0 : index
    %c0_71 = arith.constant 0 : index
    %c0_72 = arith.constant 0 : index
    %83 = vector.load %arg1[%c0_70, %c0_71, %c0_72] : memref<2x16x256xf32, #tpu.memory_space<vmem>>, vector<1x16x256xf32>
    %84 = vector.shape_cast %83 : vector<1x16x256xf32> to vector<16x256xf32>
    %85 = arith.addf %82, %84 : vector<16x256xf32>
    %c0_73 = arith.constant 0 : index
    %c0_74 = arith.constant 0 : index
    %c0_75 = arith.constant 0 : index
    %86 = vector.load %arg10[%c0_73, %c0_74, %c0_75] : memref<2x16x256xf32, #tpu.memory_space<vmem>>, vector<1x16x256xf32>
    %87 = vector.shape_cast %86 : vector<1x16x256xf32> to vector<16x256xf32>
    %88 = vector.shape_cast %85 : vector<16x256xf32> to vector<1x16x256xf32>
    tpu.vector_store %arg10[%c0_73, %c0_74, %c0_75], %88 {strides = array<i32>} : memref<2x16x256xf32, #tpu.memory_space<vmem>>, vector<1x16x256xf32>,
    %89 = vector.extract_strided_slice %54 {offsets = [18, 0], sizes = [16, 256], strides = [1, 1]} : vector<34x256xf32> to vector<16x256xf32>
    %90 = vector.extract_strided_slice %78 {offsets = [1, 0], sizes = [1, 256], strides = [1, 1]} : vector<2x256xf32> to vector<1x256xf32>
    %91 = vector.broadcast %90 : vector<1x256xf32> to vector<16x256xf32>
    %92 = arith.mulf %89, %91 : vector<16x256xf32>
    %c1_76 = arith.constant 1 : index
    %c0_77 = arith.constant 0 : index
    %c0_78 = arith.constant 0 : index
    %93 = vector.load %arg1[%c1_76, %c0_77, %c0_78] : memref<2x16x256xf32, #tpu.memory_space<vmem>>, vector<1x16x256xf32>
    %94 = vector.shape_cast %93 : vector<1x16x256xf32> to vector<16x256xf32>
    %95 = arith.addf %92, %94 : vector<16x256xf32>
    %c1_79 = arith.constant 1 : index
    %c0_80 = arith.constant 0 : index
    %c0_81 = arith.constant 0 : index
    %96 = vector.load %arg10[%c1_79, %c0_80, %c0_81] : memref<2x16x256xf32, #tpu.memory_space<vmem>>, vector<1x16x256xf32>
    %97 = vector.shape_cast %96 : vector<1x16x256xf32> to vector<16x256xf32>
    %98 = vector.shape_cast %95 : vector<16x256xf32> to vector<1x16x256xf32>
    tpu.vector_store %arg10[%c1_79, %c0_80, %c0_81], %98 {strides = array<i32>} : memref<2x16x256xf32, #tpu.memory_space<vmem>>, vector<1x16x256xf32>,
    return
  }
  func.func @transform_0(%arg0: i32) -> (i32, i32, i32) {
    %c0_i32 = arith.constant 0 : i32
    %c0_i32_0 = arith.constant 0 : i32
    %c0_i32_1 = arith.constant 0 : i32
    return %arg0, %c0_i32, %c0_i32_0 : i32, i32, i32
  }
  func.func @transform_1(%arg0: i32) -> (i32, i32, i32) {
    %c0_i32 = arith.constant 0 : i32
    %c0_i32_0 = arith.constant 0 : i32
    %c0_i32_1 = arith.constant 0 : i32
    %c0_i32_2 = arith.constant 0 : i32
    return %c0_i32, %c0_i32_0, %c0_i32_1 : i32, i32, i32
  }
  func.func @transform_2(%arg0: i32) -> (i32, i32) {
    %c0_i32 = arith.constant 0 : i32
    %c0_i32_0 = arith.constant 0 : i32
    %c0_i32_1 = arith.constant 0 : i32
    return %c0_i32, %c0_i32_0 : i32, i32
  }
  func.func @transform_3(%arg0: i32) -> (i32, i32, i32) {
    %c0_i32 = arith.constant 0 : i32
    %c0_i32_0 = arith.constant 0 : i32
    %c0_i32_1 = arith.constant 0 : i32
    %c0_i32_2 = arith.constant 0 : i32
    return %c0_i32, %c0_i32_0, %c0_i32_1 : i32, i32, i32
  }
  func.func @transform_4(%arg0: i32) -> (i32, i32) {
    %c0_i32 = arith.constant 0 : i32
    %c0_i32_0 = arith.constant 0 : i32
    %c0_i32_1 = arith.constant 0 : i32
    return %c0_i32, %c0_i32_0 : i32, i32
  }
  func.func @transform_5(%arg0: i32) -> (i32, i32) {
    %c0_i32 = arith.constant 0 : i32
    %c0_i32_0 = arith.constant 0 : i32
    %c0_i32_1 = arith.constant 0 : i32
    return %c0_i32, %c0_i32_0 : i32, i32
  }
  func.func @transform_6(%arg0: i32) -> (i32, i32) {
    %c0_i32 = arith.constant 0 : i32
    %c0_i32_0 = arith.constant 0 : i32
    %c0_i32_1 = arith.constant 0 : i32
    return %c0_i32, %c0_i32_0 : i32, i32
  }
  func.func @transform_7(%arg0: i32) -> (i32, i32) {
    %c0_i32 = arith.constant 0 : i32
    %c0_i32_0 = arith.constant 0 : i32
    %c0_i32_1 = arith.constant 0 : i32
    return %c0_i32, %c0_i32_0 : i32, i32
  }
  func.func @transform_8(%arg0: i32) -> (i32, i32) {
    %c0_i32 = arith.constant 0 : i32
    %c0_i32_0 = arith.constant 0 : i32
    %c0_i32_1 = arith.constant 0 : i32
    return %c0_i32, %c0_i32_0 : i32, i32
  }
  func.func @transform_9(%arg0: i32) -> (i32, i32, i32) {
    %c0_i32 = arith.constant 0 : i32
    %c0_i32_0 = arith.constant 0 : i32
    %c0_i32_1 = arith.constant 0 : i32
    return %arg0, %c0_i32, %c0_i32_0 : i32, i32, i32
  }
}

</mosaic_0001>

<bundles_post_ra>
// kernel: tile.39
= control target key start
LH: loop header
LB: loop body
LE: loop exit
PB: predicated region body
PF: predicated region fallthrough
CT: control target
= control target key end

     0   :  { %s15_s6 = smov 3  ;;  %s18_s7 = smov 12  ;;  %vm20_vm0 = vcmask 1043458   ;;  %vm25_vm1 = vcmask 1045508   ;;  %vm30_vm2 = vcmask 1047558   ;;  %vm4_vm3 = vcmask 1047556   ;;  %s367_s0 = inlined_call_operand.vmem [shape: f32[4,16,16], index: 0, kind: input, shape index: {}]   ;;  %s368_s1 = inlined_call_operand.vmem [shape: f32[4,256], index: 1, kind: output, shape index: {}]  }
   0x1   :  { %v196_v0 = vld [vmem:[%s367_s0 + $0x7] ss:$16 sm:%s15_s6]   ;;  %s23_s12 = smov 48  ;;  %s28_s13 = smov 192  ;;  %vm6_vm4 = vcmask 130048   ;;  %vm34_vm5 = vcmask 1048448  }
   0x2   :  { %v197_v1 = vld [vmem:[%s367_s0 + $0x7] ss:$16 sm:%s18_s7]   ;;  %v198_v3 = vld [vmem:[%s367_s0 - $0x31] ss:$16 sm:%s23_s12]   ;;  %s63_s18 = smov 3  ;;  %s66_s21 = smov 12 }
   0x3   :  { %v21_v2 = vsel %vm20_vm0, %v197_v1, %v196_v0  ;;  %v199_v4 = vld [vmem:[%s367_s0 - $0x31] ss:$16 sm:%s28_s13]   ;;  %v204_v6 = vld [vmem:[%s367_s0 + $0x5] ss:$16 sm:%s63_s18]   ;;  %s71_s22 = smov 48  ;;  %s76_s27 = smov 192 }
   0x4   :  { %v26_v5 = vsel %vm25_vm1, %v198_v3, %v21_v2  ;;  %v205_v8 = vld [vmem:[%s367_s0 + $0x5] ss:$16 sm:%s66_s21]   ;;  %v206_v9 = vld [vmem:[%s367_s0 - $0x33] ss:$16 sm:%s71_s22]   ;;  %s232_s28 = smov 112   ;;  %s39_s2 = smov 3 }
   0x5   :  { %v31_v7 = vsel %vm30_vm2, %v199_v4, %v26_v5  ;;  %v69_v10 = vsel %vm20_vm0, %v205_v8, %v204_v6  ;;  %v207_v11 = vld [vmem:[%s367_s0 - $0x33] ss:$16 sm:%s76_s27]   ;;  %s42_s3 = smov 12  ;;  %v200_v13 = vld [vmem:[%s367_s0 + $0x6] ss:$16 sm:%s39_s2]   ;;  %s47_s8 = smov 48 }
   0x6   :  { %32 = vrot.lane.b32.xlu0 %v31_v7, %s232_s28  ;;  %v74_v12 = vsel %vm25_vm1, %v206_v9, %v69_v10  ;;  %v201_v14 = vld [vmem:[%s367_s0 + $0x6] ss:$16 sm:%s42_s3]   ;;  %s52_s9 = smov 192  ;;  %s87_s14 = smov 3  ;;  %vm58_vm6 = vcmask 917248   ;;  %vm82_vm7 = vcmask 786048  }
   0x7   :  { %v79_v15 = vsel %vm30_vm2, %v207_v11, %v74_v12  ;;  %v45_v16 = vsel %vm20_vm0, %v201_v14, %v200_v13  ;;  %v202_v17 = vld [vmem:[%s367_s0 - $0x32] ss:$16 sm:%s47_s8]   ;;  %s233_s15 = smov 80   ;;  %v208_v20 = vld [vmem:[%s367_s0 + $0x4] ss:$16 sm:%s87_s14]   ;;  %s90_s18 = smov 12 }
   0x8   :  { %v203_v18 = vld [vmem:[%s367_s0 - $0x32] ss:$16 sm:%s52_s9]   ;;  %80 = vrot.lane.b32.xlu1 %v79_v15, %s233_s15  ;;  %v50_v19 = vsel %vm25_vm1, %v202_v17, %v45_v16  ;;  %s95_s19 = smov 48  ;;  %s100_s24 = smov 192  ;;  %vm106_vm8 = vcmask 654848   ;;  %vm130_vm9 = vcmask 523648  }
   0x9   :  { %v55_v21 = vsel %vm30_vm2, %v203_v18, %v50_v19  ;;  %v209_v22 = vld [vmem:[%s367_s0 + $0x4] ss:$16 sm:%s90_s18]   ;;  %v210_v23 = vld [vmem:[%s367_s0 - $0x34] ss:$16 sm:%s95_s19]   ;;  %s234_s25 = smov 96   ;;  %s111_s28 = smov 3 }
   0xa   :  { %56 = vrot.lane.b32.xlu0 %v55_v21, %s234_s25  ;;  %v93_v24 = vsel %vm20_vm0, %v209_v22, %v208_v20  ;;  %v211_v25 = vld [vmem:[%s367_s0 - $0x34] ss:$16 sm:%s100_s24]   ;;  %s114_s29 = smov 12  ;;  %s119_s5 = smov 48  ;;  %vm154_vm10 = vcmask 392448   ;;  %vm178_vm11 = vcmask 261248  }
   0xb   :  { %v98_v26 = vsel %vm25_vm1, %v210_v23, %v93_v24  ;;  %v212_v27 = vld [vmem:[%s367_s0 + $0x3] ss:$16 sm:%s111_s28]   ;;  %s124_s6 = smov 192  ;;  %v214_v31 = vld [vmem:[%s367_s0 - $0x35] ss:$16 sm:%s119_s5]   ;;  %s135_s11 = smov 3 }
   0xc   :  { %v213_v28 = vld [vmem:[%s367_s0 + $0x3] ss:$16 sm:%s114_s29]   ;;  %v103_v29 = vsel %vm30_vm2, %v211_v25, %v98_v26  ;;  %v215_v32 = vld [vmem:[%s367_s0 - $0x35] ss:$16 sm:%s124_s6]   ;;  %s235_s12 = smov 64   ;;  %s138_s15 = smov 12 }
   0xd   :  { %v117_v30 = vsel %vm20_vm0, %v213_v28, %v212_v27  ;;  %104 = vrot.lane.b32.xlu1 %v103_v29, %s235_s12  ;;  %v216_v34 = vld [vmem:[%s367_s0 + $0x2] ss:$16 sm:%s135_s11]   ;;  %s143_s16 = smov 48  ;;  %s148_s21 = smov 192 }
   0xe   :  { %v122_v33 = vsel %vm25_vm1, %v214_v31, %v117_v30  ;;  %v217_v36 = vld [vmem:[%s367_s0 + $0x2] ss:$16 sm:%s138_s15]   ;;  %v218_v37 = vld [vmem:[%s367_s0 - $0x36] ss:$16 sm:%s143_s16]   ;;  %s236_s22 = smov 48   ;;  %s159_s25 = smov 3 }
   0xf   :  { %v127_v35 = vsel %vm30_vm2, %v215_v32, %v122_v33  ;;  %v141_v38 = vsel %vm20_vm0, %v217_v36, %v216_v34  ;;  %v219_v39 = vld [vmem:[%s367_s0 - $0x36] ss:$16 sm:%s148_s21]   ;;  %s162_s26 = smov 12  ;;  %v220_v41 = vld [vmem:[%s367_s0 + $0x1] ss:$16 sm:%s159_s25]   ;;  %s167_s2 = smov 48 }
  0x10   :  { %128 = vrot.lane.b32.xlu0 %v127_v35, %s236_s22  ;;  %v146_v40 = vsel %vm25_vm1, %v218_v37, %v141_v38  ;;  %v221_v42 = vld [vmem:[%s367_s0 + $0x1] ss:$16 sm:%s162_s26]   ;;  %s172_s3 = smov 192  ;;  %s237_s8 = smov 32  }
  0x11   :  { %v151_v43 = vsel %vm30_vm2, %v219_v39, %v146_v40  ;;  %v165_v44 = vsel %vm20_vm0, %v221_v42, %v220_v41  ;;  %v222_v45 = vld [vmem:[%s367_s0 - $0x37] ss:$16 sm:%s167_s2]   ;;  %v2_v48 = vld [vmem:[%s367_s0] ss:$8 sm:$0xf]  }
  0x12   :  { %v223_v46 = vld [vmem:[%s367_s0 - $0x37] ss:$16 sm:%s172_s3]   ;;  %152 = vrot.lane.b32.xlu1 %v151_v43, %s237_s8  ;;  %v170_v47 = vsel %vm25_vm1, %v222_v45, %v165_v44  ;;  %v3_v49 = vld [vmem:[%s367_s0] ss:$8 sm:$0xf0]   ;;  %s238_s0 = smov 16  }
  0x13   :  { %v175_v50 = vsel %vm30_vm2, %v223_v46, %v170_v47  ;;  %v5_v51 = vsel %vm4_vm3, %v3_v49, %v2_v48 }
  0x14   :  { %176 = vrot.lane.b32.xlu0 %v175_v50, %s238_s0  ;;  %7 = vst.msk [vmem:[#allocation0] ss:$8 sm:$0x3] %vm6_vm4, %v5_v51   ;;  %9 = vst.msk [vmem:[#allocation0 - $0xf] ss:$8 sm:$0xc] %vm6_vm4, %v5_v51  }
  0x15   :  { %11 = vst.msk [vmem:[#allocation0 - $0x1e] ss:$8 sm:$0x30] %vm6_vm4, %v5_v51   ;;  %13 = vst.msk [vmem:[#allocation0 - $0x2d] ss:$8 sm:$0xc0] %vm6_vm4, %v5_v51  }
  0x78   :  { %v33_v52 = vpop.permute.xlu0 %32  }
  0x79   :  { %35 = vst.msk [vmem:[#allocation0] sm:$0xf] %vm34_vm5, %v33_v52   ;;  %37 = vst.msk [vmem:[#allocation0 + $0x4] sm:$0xf0] %vm34_vm5, %v33_v52  }
  0x7a   :  { %v81_v53 = vpop.permute.xlu1 %80  }
  0x7c   :  { %v57_v54 = vpop.permute.xlu0 %56  }
  0x7d   :  { %59 = vst.msk [vmem:[#allocation0] sm:$0xf] %vm58_vm6, %v57_v54   ;;  %61 = vst.msk [vmem:[#allocation0 + $0x4] sm:$0xf0] %vm58_vm6, %v57_v54  }
  0x7e   :  { %83 = vst.msk [vmem:[#allocation0] sm:$0xf] %vm82_vm7, %v81_v53   ;;  %85 = vst.msk [vmem:[#allocation0 + $0x4] sm:$0xf0] %vm82_vm7, %v81_v53  }
  0x7f   :  { %v105_v55 = vpop.permute.xlu1 %104  }
  0x80   :  { %107 = vst.msk [vmem:[#allocation0] sm:$0xf] %vm106_vm8, %v105_v55   ;;  %109 = vst.msk [vmem:[#allocation0 + $0x4] sm:$0xf0] %vm106_vm8, %v105_v55  }
  0x82   :  { %v129_v56 = vpop.permute.xlu0 %128  }
  0x83   :  { %131 = vst.msk [vmem:[#allocation0] sm:$0xf] %vm130_vm9, %v129_v56   ;;  %133 = vst.msk [vmem:[#allocation0 + $0x4] sm:$0xf0] %vm130_vm9, %v129_v56  }
  0x84   :  { %v153_v57 = vpop.permute.xlu1 %152  }
  0x85   :  { %155 = vst.msk [vmem:[#allocation0] sm:$0xf] %vm154_vm10, %v153_v57   ;;  %157 = vst.msk [vmem:[#allocation0 + $0x4] sm:$0xf0] %vm154_vm10, %v153_v57  }
  0x86   :  { %v177_v58 = vpop.permute.xlu0 %176  }
  0x87   :  { %179 = vst.msk [vmem:[#allocation0] sm:$0xf] %vm178_vm11, %v177_v58   ;;  %181 = vst.msk [vmem:[#allocation0 + $0x4] sm:$0xf0] %vm178_vm11, %v177_v58  }
  0x8e   :  { %v186_v59 = vld [vmem:[#allocation0] sm:$0xf]  ;;  %v191_v60 = vld [vmem:[#allocation0 + $0x8] sm:$0xf] }
  0x8f   :  { %189 = vst [vmem:[%s368_s1] sm:$0xf] %v186_v59  ;;  %224 = vst [vmem:[%s368_s1 + $0x4] sm:$0xf] %v191_v60 }

// kernel: rcab_forward_folded.1
= control target key start
LH: loop header
LB: loop body
LE: loop exit
PB: predicated region body
PF: predicated region fallthrough
CT: control target
= control target key end

     0   :  { %vm35_vm0 = vsmask.f32 256  ;;  %vm38_vm1 = vsmask.f32 4352  ;;  %vm4297_vm2 = vcmask 1040384   ;;  %vm37_vm3 = vcmask 1044484   ;;  %s4287_s0 = inlined_call_operand.vmem [shape: f32[2,16,256], index: 0, kind: input, shape index: {}]   ;;  %s4288_s1 = inlined_call_operand.vmem [shape: bf16[3,256,256], index: 1, kind: input, shape index: {}]   ;;  %s4289_s2 = inlined_call_operand.vmem [shape: f32[1,256], index: 2, kind: input, shape index: {}]   ;;  %s4290_s3 = inlined_call_operand.vmem [shape: bf16[3,256,256], index: 3, kind: input, shape index: {}]   ;;  %s4291_s4 = inlined_call_operand.vmem [shape: f32[1,256], index: 4, kind: input, shape index: {}]   ;;  %s4292_s5 = inlined_call_operand.vmem [shape: f32[256,4], index: 5, kind: input, shape index: {}]   ;;  %s4293_s6 = inlined_call_operand.vmem [shape: f32[1,4], index: 6, kind: input, shape index: {}]   ;;  %s4294_s7 = inlined_call_operand.vmem [shape: f32[4,256], index: 7, kind: input, shape index: {}]   ;;  %s4295_s8 = inlined_call_operand.vmem [shape: f32[1,256], index: 8, kind: input, shape index: {}]   ;;  %s4296_s9 = inlined_call_operand.hbm [shape: f32[2,16,256], index: 9, kind: output, shape index: {}]  }
   0x1   :  { %v2871_v0 = vld [vmem:[%s4288_s1 + $0x174] ss:$8 sps:$4 sm:$0xff]   ;;  %v2875_v2 = vld [vmem:[%s4288_s1 + $0x170] ss:$8 sps:$4 sm:$0xff]   ;;  %v2877_v4 = vld [vmem:[%s4288_s1 + $0x164] ss:$8 sps:$4 sm:$0xff]  }
   0x2   :  { %v2873_v1 = vld [vmem:[%s4288_s1 + $0x74] ss:$8 sps:$4 sm:$0xff]   ;;  %479 = vmatprep.subr.bf16.mxu0 %v2871_v0  ;;  %v2876_v3 = vld [vmem:[%s4288_s1 + $0x70] ss:$8 sps:$4 sm:$0xff]   ;;  %v2879_v5 = vld [vmem:[%s4288_s1 + $0x64] ss:$8 sps:$4 sm:$0xff]  }
   0x3   :  { %711 = vmatprep.subr.bf16.mxu1 %v2873_v1  ;;  %480 = vmatpush1.bf16.msra.mxu0 %v2875_v2  ;;  %v2881_v6 = vld [vmem:[%s4288_s1 + $0x160] ss:$8 sps:$4 sm:$0xff]   ;;  %v2883_v8 = vld [vmem:[%s4288_s1 + $0x154] ss:$8 sps:$4 sm:$0xff]   ;;  %v2887_v10 = vld [vmem:[%s4288_s1 + $0x150] ss:$8 sps:$4 sm:$0xff]  }
   0x4   :  { %712 = vmatpush1.bf16.msra.mxu1 %v2876_v3  ;;  %481 = vmatprep.subr.bf16.mxu0 %v2877_v4  ;;  %v2882_v7 = vld [vmem:[%s4288_s1 + $0x60] ss:$8 sps:$4 sm:$0xff]   ;;  %v2885_v9 = vld [vmem:[%s4288_s1 + $0x54] ss:$8 sps:$4 sm:$0xff]   ;;  %v2888_v11 = vld [vmem:[%s4288_s1 + $0x50] ss:$8 sps:$4 sm:$0xff]  }
   0x5   :  { %713 = vmatprep.subr.bf16.mxu1 %v2879_v5  ;;  %v2889_v12 = vld [vmem:[%s4288_s1 + $0x144] ss:$8 sps:$4 sm:$0xff]   ;;  %v2893_v14 = vld [vmem:[%s4288_s1 + $0x140] ss:$8 sps:$4 sm:$0xff]   ;;  %v2895_v16 = vld [vmem:[%s4288_s1 + $0x134] ss:$8 sps:$4 sm:$0xff]  }
   0x6   :  { %v2891_v13 = vld [vmem:[%s4288_s1 + $0x44] ss:$8 sps:$4 sm:$0xff]   ;;  %v2894_v15 = vld [vmem:[%s4288_s1 + $0x40] ss:$8 sps:$4 sm:$0xff]   ;;  %v2897_v17 = vld [vmem:[%s4288_s1 + $0x34] ss:$8 sps:$4 sm:$0xff]  }
   0x7   :  { %482 = vmatpush1.bf16.msra.mxu0 %v2881_v6  ;;  %v2899_v18 = vld [vmem:[%s4288_s1 + $0x130] ss:$8 sps:$4 sm:$0xff]   ;;  %v2901_v20 = vld [vmem:[%s4288_s1 + $0x124] ss:$8 sps:$4 sm:$0xff]   ;;  %v2905_v22 = vld [vmem:[%s4288_s1 + $0x120] ss:$8 sps:$4 sm:$0xff]  }
   0x8   :  { %714 = vmatpush1.bf16.msra.mxu1 %v2882_v7  ;;  %483 = vmatprep.subr.bf16.mxu0 %v2883_v8  ;;  %v2900_v19 = vld [vmem:[%s4288_s1 + $0x30] ss:$8 sps:$4 sm:$0xff]   ;;  %v2903_v21 = vld [vmem:[%s4288_s1 + $0x24] ss:$8 sps:$4 sm:$0xff]   ;;  %v2906_v23 = vld [vmem:[%s4288_s1 + $0x20] ss:$8 sps:$4 sm:$0xff]  }
   0x9   :  { %715 = vmatprep.subr.bf16.mxu1 %v2885_v9  ;;  %v2907_v24 = vld [vmem:[%s4288_s1 + $0x114] ss:$8 sps:$4 sm:$0xff]   ;;  %v2911_v26 = vld [vmem:[%s4288_s1 + $0x110] ss:$8 sps:$4 sm:$0xff]   ;;  %v2913_v28 = vld [vmem:[%s4288_s1 + $0x104] ss:$8 sps:$4 sm:$0xff]  }
   0xa   :  { %v2909_v25 = vld [vmem:[%s4288_s1 + $0x14] ss:$8 sps:$4 sm:$0xff]   ;;  %v2912_v27 = vld [vmem:[%s4288_s1 + $0x10] ss:$8 sps:$4 sm:$0xff]   ;;  %v2915_v29 = vld [vmem:[%s4288_s1 + $0x4] ss:$8 sps:$4 sm:$0xff]  }
   0xb   :  { %484 = vmatpush1.bf16.msra.mxu0 %v2887_v10  ;;  %v2917_v30 = vld [vmem:[%s4288_s1 + $0x100] ss:$8 sps:$4 sm:$0xff]   ;;  %v2919_v32 = vld [vmem:[%s4288_s1 + $0x1f4] ss:$8 sps:$4 sm:$0xff]   ;;  %v2923_v34 = vld [vmem:[%s4288_s1 + $0x1f0] ss:$8 sps:$4 sm:$0xff]  }
   0xc   :  { %716 = vmatpush1.bf16.msra.mxu1 %v2888_v11  ;;  %485 = vmatprep.subr.bf16.mxu0 %v2889_v12  ;;  %v2918_v31 = vld [vmem:[%s4288_s1] ss:$8 sps:$4 sm:$0xff]   ;;  %v2921_v33 = vld [vmem:[%s4288_s1 + $0xf4] ss:$8 sps:$4 sm:$0xff]   ;;  %v2924_v35 = vld [vmem:[%s4288_s1 + $0xf0] ss:$8 sps:$4 sm:$0xff]  }
   0xd   :  { %717 = vmatprep.subr.bf16.mxu1 %v2891_v13  ;;  %v2925_v36 = vld [vmem:[%s4288_s1 + $0x1e4] ss:$8 sps:$4 sm:$0xff]   ;;  %v2929_v38 = vld [vmem:[%s4288_s1 + $0x1e0] ss:$8 sps:$4 sm:$0xff]   ;;  %v2931_v40 = vld [vmem:[%s4288_s1 + $0x1d4] ss:$8 sps:$4 sm:$0xff]  }
   0xe   :  { %v2927_v37 = vld [vmem:[%s4288_s1 + $0xe4] ss:$8 sps:$4 sm:$0xff]   ;;  %v2930_v39 = vld [vmem:[%s4288_s1 + $0xe0] ss:$8 sps:$4 sm:$0xff]   ;;  %v2933_v41 = vld [vmem:[%s4288_s1 + $0xd4] ss:$8 sps:$4 sm:$0xff]  }
   0xf   :  { %486 = vmatpush1.bf16.msra.mxu0 %v2893_v14  ;;  %v2935_v42 = vld [vmem:[%s4288_s1 + $0x1d0] ss:$8 sps:$4 sm:$0xff]   ;;  %v2937_v44 = vld [vmem:[%s4288_s1 + $0x1c4] ss:$8 sps:$4 sm:$0xff]   ;;  %v2941_v46 = vld [vmem:[%s4288_s1 + $0x1c0] ss:$8 sps:$4 sm:$0xff]  }
  0x10   :  { %718 = vmatpush1.bf16.msra.mxu1 %v2894_v15  ;;  %487 = vmatprep.subr.bf16.mxu0 %v2895_v16  ;;  %v2936_v43 = vld [vmem:[%s4288_s1 + $0xd0] ss:$8 sps:$4 sm:$0xff]   ;;  %v2939_v45 = vld [vmem:[%s4288_s1 + $0xc4] ss:$8 sps:$4 sm:$0xff]   ;;  %v2942_v47 = vld [vmem:[%s4288_s1 + $0xc0] ss:$8 sps:$4 sm:$0xff]  }
  0x11   :  { %719 = vmatprep.subr.bf16.mxu1 %v2897_v17  ;;  %vm36_vm4 = vmand %vm4297_vm2, %vm35_vm0  ;;  %vm44_vm5 = vsmask.f32 7938  ;;  %v2943_v48 = vld [vmem:[%s4288_s1 + $0x1b4] ss:$8 sps:$4 sm:$0xff]   ;;  %vm46_vm7 = vsmask.f32 7954 }
  0x12   :  { %v2945_v49 = vld [vmem:[%s4288_s1 + $0xb4] ss:$8 sps:$4 sm:$0xff]   ;;  %vm39_vm6 = vmand %vm37_vm3, %vm38_vm1  ;;  %v49_v52 = vld [vmem:[#allocation2] sm:$0x11]  ;;  %vm52_vm10 = vcmask 1041409   ;;  %vm55_vm13 = vcmask 1045509  }
  0x13   :  { %488 = vmatpush1.bf16.msra.mxu0 %v2899_v18  ;;  %v41_v50 = vld [vmem:[#allocation2 + $0x10] sm:$0x11]  ;;  %vm3405_vm8 = vmor %vm39_vm6, %vm36_vm4  ;;  %v70_v53 = vld [vmem:[%s4287_s0] sm:$0xff]  ;;  %vm53_vm11 = vsmask.f32 1280  ;;  %vm4299_vm15 = vcmask 1043456  }
  0x14   :  { %720 = vmatpush1.bf16.msra.mxu1 %v2900_v19  ;;  %489 = vmatprep.subr.bf16.mxu0 %v2901_v20  ;;  %v42_v54 = vsel %vm3405_vm8, 0, %v41_v50  ;;  %vm3416_vm9 = vmand %vm4297_vm2, %vm44_vm5  ;;  %v71_v56 = vld [vmem:[%s4287_s0 + $0x8] sm:$0xff]  ;;  %v72_v57 = vld [vmem:[%s4287_s0 + $0x10] sm:$0xff]  ;;  %vm4298_vm14 = vsmask.f32 5376 }
  0x15   :  { %721 = vmatprep.subr.bf16.mxu1 %v2903_v21  ;;  %v2947_v58 = vld [vmem:[%s4288_s1 + $0x1b0] ss:$8 sps:$4 sm:$0xff]   ;;  %43 = vst [vmem:[#allocation2 + $0x10] sm:$0x11] %v42_v54  ;;  %vm3434_vm12 = vmand %vm37_vm3, %vm46_vm7  ;;  %v59_v61 = vld [vmem:[#allocation2] sm:$0x22]  ;;  %v2823_v63 = vpack.c.bf16 %v71_v56, %v70_v53 }
  0x16   :  { %v2948_v59 = vld [vmem:[%s4288_s1 + $0xb0] ss:$8 sps:$4 sm:$0xff]   ;;  %v2462_v0 = vld [vmem:[%s4287_s0 + $0x20] sm:$0xff]  ;;  %vm48_vm1 = vmor %vm3434_vm12, %vm3416_vm9  ;;  %vm62_vm3 = vsmask.f32 7942  ;;  %vm108_vm12 = vcmask 1047556  }
  0x17   :  { %490 = vmatpush1.bf16.msra.mxu0 %v2905_v22  ;;  %v73_v62 = vld [vmem:[%s4287_s0 + $0x18] sm:$0xff]  ;;  %v2949_v1 = vld [vmem:[%s4288_s1 + $0x1a4] ss:$8 sps:$4 sm:$0xff]   ;;  %vm84_vm4 = vsmask.f32 4368  ;;  %v2464_v4 = vld [vmem:[%s4287_s0 + $0x30] sm:$0xff] }
  0x18   :  { %722 = vmatpush1.bf16.msra.mxu1 %v2906_v23  ;;  %491 = vmatprep.subr.bf16.mxu0 %v2907_v24  ;;  %v2824_v2 = vpack.c.bf16 %v73_v62, %v72_v57  ;;  %v2463_v3 = vld [vmem:[%s4287_s0 + $0x28] sm:$0xff]  ;;  %v50_v5 = vsel %vm48_vm1, 0, %v49_v52  ;;  %vm3459_vm6 = vmand %vm52_vm10, %vm53_vm11  ;;  %v87_v7 = vshrl.u32 %v2823_v63, 16  ;;  %v90_v8 = vshll.u32 %v2823_v63, 16  ;;  %v2465_v9 = vld [vmem:[%s4287_s0 + $0x38] sm:$0xff] }
  0x19   :  { %723 = vmatprep.subr.bf16.mxu1 %v2909_v25  ;;  %v2825_v10 = vpack.c.bf16 %v2463_v3, %v2462_v0  ;;  %v2951_v11 = vld [vmem:[%s4288_s1 + $0xa4] ss:$8 sps:$4 sm:$0xff]   ;;  %51 = vst [vmem:[#allocation2] sm:$0x11] %v50_v5  ;;  %vm57_vm9 = vmand %vm55_vm13, %vm4298_vm14  ;;  %v2953_v14 = vld [vmem:[%s4288_s1 + $0x1a0] ss:$8 sps:$4 sm:$0xff]   ;;  %v2826_v17 = vpack.c.bf16 %v2465_v9, %v2464_v4 }
  0x1a   :  { %v95_v12 = vshrl.u32 %v2824_v2, 16  ;;  %v98_v13 = vshll.u32 %v2824_v2, 16  ;;  %v2954_v15 = vld [vmem:[%s4288_s1 + $0xa0] ss:$8 sps:$4 sm:$0xff]   ;;  %vm58_vm1 = vmor %vm57_vm9, %vm3459_vm6  ;;  %v89_v16 = vrot.slane %v87_v7, 7  ;;  %vm159_vm9 = vcmask 1047557  }
  0x1b   :  { %492 = vmatpush1.bf16.msra.mxu0 %v2911_v26  ;;  %v136_v18 = vshrl.u32 %v2825_v10, 16  ;;  %v139_v19 = vshll.u32 %v2825_v10, 16  ;;  %v60_v20 = vsel %vm58_vm1, 0, %v59_v61  ;;  %vm64_vm2 = vsmask.f32 7958  ;;  %vm3481_vm14 = vmor %vm35_vm0, %vm84_vm4 }
  0x1c   :  { %724 = vmatpush1.bf16.msra.mxu1 %v2912_v27  ;;  %493 = vmatprep.subr.bf16.mxu0 %v2913_v28  ;;  %v97_v22 = vrot.slane %v95_v12, 7  ;;  %v2955_v23 = vld [vmem:[%s4288_s1 + $0x194] ss:$8 sps:$4 sm:$0xff]   ;;  %61 = vst [vmem:[#allocation2] sm:$0x22] %v60_v20  ;;  %v92_v24 = vor.u32 %v90_v8, %v89_v16  ;;  %v93_v25 = vrot.slane %v89_v16, 4  ;;  %vm3490_vm6 = vmand %vm4299_vm15, %vm44_vm5 }
  0x1d   :  { %725 = vmatprep.subr.bf16.mxu1 %v2915_v29  ;;  %v138_v27 = vrot.slane %v136_v18, 6  ;;  %v141_v28 = vrot.slane %v139_v19, 7  ;;  %v2957_v29 = vld [vmem:[%s4288_s1 + $0x94] ss:$8 sps:$4 sm:$0xff]   ;;  %vm3499_vm0 = vmand %vm108_vm12, %vm46_vm7  ;;  %vm157_vm5 = vcmask 1043457  }
  0x1e   :  { %vm4301_vm4 = vmor %vm3499_vm0, %vm3490_vm6  ;;  %v2965_v53 = vld [vmem:[%s4288_s1 + $0x180] ss:$8 sps:$4 sm:$0xff]   ;;  %v2969_v56 = vld [vmem:[%s4288_s1 + $0x274] ss:$8 sps:$4 sm:$0xff]  }
  0x1f   :  { %494 = vmatpush1.bf16.msra.mxu0 %v2917_v30  ;;  %v100_v30 = vor.u32 %v98_v13, %v97_v22  ;;  %vm3530_vm7 = vmand %vm157_vm5, %vm62_vm3  ;;  %vm133_vm5 = vsmask.f32 5392  ;;  %v2966_v54 = vld [vmem:[%s4288_s1 + $0x80] ss:$8 sps:$4 sm:$0xff]   ;;  %v67_v3 = vld [vmem:[#allocation2 + $0x18] sm:$0x22] }
  0x20   :  { %726 = vmatpush1.bf16.msra.mxu1 %v2918_v31  ;;  %495 = vmatprep.subr.bf16.mxu0 %v2919_v32  ;;  %v102_v31 = vrot.slane %v97_v22, 4  ;;  %vm3543_vm12 = vmand %vm159_vm9, %vm64_vm2  ;;  %v2972_v19 = vld [vmem:[%s4288_s1 + $0x264] ss:$8 sps:$4 sm:$0xff]   ;;  %v2970_v20 = vld [vmem:[%s4288_s1 + $0x260] ss:$8 sps:$4 sm:$0xff]  }
  0x21   :  { %727 = vmatprep.subr.bf16.mxu1 %v2921_v33  ;;  %v111_v33 = vld [vmem:[#allocation2 + $0x10] sm:$0xff]  ;;  %vm4300_vm1 = vmor %vm3543_vm12, %vm3530_vm7 }
  0x22   :  { %vm134_vm9 = vmor %vm53_vm11, %vm133_vm5  ;;  %v2975_v22 = vld [vmem:[%s4288_s1 + $0x254] ss:$8 sps:$4 sm:$0xff]  }
  0x23   :  { %496 = vmatpush2.bf16.msra.mxu0 %v2923_v34  ;;  %v2959_v34 = vld [vmem:[%s4288_s1 + $0x190] ss:$8 sps:$4 sm:$0xff]   ;;  %v162_v50 = vld [vmem:[#allocation2] sm:$0xee]  ;;  %vm63_vm15 = vmand %vm52_vm10, %vm62_vm3  ;;  %vm266_vm10 = vsmask.f32 7424 }
  0x24   :  { %728 = vmatpush2.bf16.msra.mxu1 %v2924_v35  ;;  %497 = vmatprep.subr.bf16.mxu0 %v2925_v36  ;;  %v145_v35 = vshrl.u32 %v2826_v17, 16  ;;  %v148_v36 = vshll.u32 %v2826_v17, 16  ;;  %vm811_vm3 = vcmask 1046528  }
  0x25   :  { %729 = vmatprep.subr.bf16.mxu1 %v2927_v37  ;;  %v2960_v37 = vld [vmem:[%s4288_s1 + $0x90] ss:$8 sps:$4 sm:$0xff]  }
  0x27   :  { %498 = vmatpush2.bf16.msra.mxu0 %v2929_v38  ;;  %v3515_v38 = vsel %vm3481_vm14, %v93_v25, %v100_v30 }
  0x28   :  { %730 = vmatpush2.bf16.msra.mxu1 %v2930_v39  ;;  %499 = vmatprep.subr.bf16.mxu0 %v2931_v40  ;;  %v3522_v39 = vsel %vm4301_vm4, %v92_v24, %v111_v33  ;;  %v2961_v40 = vld [vmem:[%s4288_s1 + $0x184] ss:$8 sps:$4 sm:$0xff]   ;;  %vm166_vm4 = vcmask 1041408  }
  0x29   :  { %731 = vmatprep.subr.bf16.mxu1 %v2933_v41  ;;  %113 = vst [vmem:[#allocation2 + $0x10] sm:$0xff] %v3522_v39  ;;  %v115_v41 = vld [vmem:[#allocation2] sm:$0x11]  ;;  %v2500_v52 = vcombine.low %v3522_v39, %v3515_v38 }
  0x2b   :  { %500 = vmatpush2.bf16.msra.mxu0 %v2935_v42  ;;  %v142_v42 = vor.u32 %v141_v28, %v138_v27  ;;  %v270_v60 = vshll.u32 %v2500_v52, 16  ;;  %v268_v0 = vshrl.u32 %v2500_v52, 16 }
  0x2c   :  { %732 = vmatpush2.bf16.msra.mxu1 %v2936_v43  ;;  %501 = vmatprep.subr.bf16.mxu0 %v2937_v44  ;;  %v2501_v44 = vcombine.high %v3522_v39, %v3515_v38 }
  0x2d   :  { %733 = vmatprep.subr.bf16.mxu1 %v2939_v45  ;;  %v2963_v45 = vld [vmem:[%s4288_s1 + $0x84] ss:$8 sps:$4 sm:$0xff]   ;;  %v163_v55 = vsel %vm4300_vm1, %v142_v42, %v162_v50  ;;  %v143_v57 = vrot.slane %v142_v42, 4  ;;  %vm65_vm1 = vmand %vm55_vm13, %vm64_vm2  ;;  %vm4322_vm13 = vsmask.f32 5376 }
  0x2e   :  { %743 = vmatprep.mubr.bf16.mxu1 %v2501_v44  ;;  %164 = vst [vmem:[#allocation2] sm:$0xee] %v163_v55  ;;  %v280_v62 = vshrl.u32 %v2501_v44, 16  ;;  %vm66_vm5 = vmor %vm65_vm1, %vm63_vm15  ;;  %v2979_v42 = vld [vmem:[%s4288_s1 + $0x230] ss:$8 sps:$4 sm:$0xff]  }
  0x2f   :  { %502 = vmatpush2.bf16.msra.mxu0 %v2941_v46  ;;  %v116_v46 = vsel %vm3405_vm8, %v102_v31, %v115_v41  ;;  %v68_v6 = vsel %vm66_vm5, 0, %v67_v3  ;;  %vm3581_vm2 = vmand %vm166_vm4, %vm53_vm11  ;;  %v2978_v31 = vld [vmem:[%s4288_s1 + $0x244] ss:$8 sps:$4 sm:$0xff]  }
  0x30   :  { %734 = vmatpush2.bf16.msra.mxu1 %v2942_v47  ;;  %503 = vmatprep.subr.bf16.mxu0 %v2943_v48  ;;  %117 = vst [vmem:[#allocation2] sm:$0x11] %v116_v46  ;;  %v147_v48 = vrot.slane %v145_v35, 6  ;;  %69 = vst [vmem:[#allocation2 + $0x18] sm:$0x22] %v68_v6 }
  0x31   :  { %735 = vmatprep.subr.bf16.mxu1 %v2945_v49  ;;  %v150_v49 = vrot.slane %v148_v36, 7  ;;  %v2981_v35 = vld [vmem:[%s4288_s1 + $0x234] ss:$8 sps:$4 sm:$0xff]  }
  0x33   :  { %504 = vmatpush2.bf16.msra.mxu0 %v2947_v58  ;;  %v151_v58 = vor.u32 %v150_v49, %v147_v48  ;;  %v2984_v49 = vld [vmem:[%s4288_s1 + $0x224] ss:$8 sps:$4 sm:$0xff]  }
  0x34   :  { %736 = vmatpush2.bf16.msra.mxu1 %v2948_v59  ;;  %505 = vmatprep.subr.bf16.mxu0 %v2949_v1  ;;  %v282_v59 = vshll.u32 %v2501_v44, 16  ;;  %v272_v1 = vrot.slane %v270_v60, 1 }
  0x35   :  { %737 = vmatprep.subr.bf16.mxu1 %v2951_v11  ;;  %v152_v61 = vsel %vm134_vm9, %v143_v57, %v151_v58  ;;  %vm168_vm9 = vcmask 1045508   ;;  %v153_v16 = vrot.slane %v151_v58, 4 }
  0x36   :  { %v284_v63 = vrot.slane %v282_v59, 1  ;;  %v273_v9 = vor.u32 %v272_v1, %v268_v0  ;;  %vm3586_vm15 = vmand %vm168_vm9, %vm4322_vm13  ;;  %v2987_v59 = vld [vmem:[%s4288_s1 + $0x214] ss:$8 sps:$4 sm:$0xff]   ;;  %v2985_v0 = vld [vmem:[%s4288_s1 + $0x210] ss:$8 sps:$4 sm:$0xff]  }
  0x37   :  { %506 = vmatpush2.bf16.msra.mxu0 %v2953_v14  ;;  %v176_v2 = vld [vmem:[#allocation2] sm:$0xff]  ;;  %vm170_vm11 = vmor %vm3586_vm15, %vm3581_vm2  ;;  %v171_v24 = vld [vmem:[#allocation2 + $0x18] sm:$0x33] }
  0x38   :  { %738 = vmatpush2.bf16.msra.mxu1 %v2954_v15  ;;  %507 = vmatprep.subr.bf16.mxu0 %v2955_v23  ;;  %v3572_v4 = vcombine.high %v176_v2, %v152_v61  ;;  %v3574_v5 = vcombine.low %v176_v2, %v152_v61  ;;  %v285_v7 = vor.u32 %v284_v63, %v280_v62  ;;  %v2967_v15 = vld [vmem:[%s4288_s1 + $0x270] ss:$8 sps:$4 sm:$0xff]   ;;  %v2990_v2 = vld [vmem:[%s4288_s1 + $0x204] ss:$8 sps:$4 sm:$0xff]  }
  0x39   :  { %739 = vmatprep.subr.bf16.mxu1 %v2957_v29  ;;  %v772_v23 = vld [vmem:[#allocation2 + $0x10] sm:$0xee]  ;;  %v172_v28 = vsel %vm170_vm11, %v153_v16, %v171_v24 }
  0x3a   :  { %v287_v8 = vshll.u32 %v3572_v4, 16  ;;  %v275_v10 = vshll.u32 %v3574_v5, 16  ;;  %v2604_v25 = vcombine.low %v772_v23, %v3515_v38  ;;  %v813_v27 = vrot.slane %v3574_v5, 1  ;;  %v2973_v29 = vld [vmem:[%s4288_s1 + $0x250] ss:$8 sps:$4 sm:$0xff]  }
  0x3b   :  { %508 = vmatpush2.bf16.msra.mxu0 %v2959_v34  ;;  %173 = vst [vmem:[#allocation2 + $0x18] sm:$0x33] %v172_v28  ;;  %v2976_v34 = vld [vmem:[%s4288_s1 + $0x240] ss:$8 sps:$4 sm:$0xff]   ;;  %v299_v36 = vshrl.u32 %v3572_v4, 16  ;;  %v2605_v63 = vcombine.high %v772_v23, %v3515_v38  ;;  %v816_v6 = vrot.slane %v3572_v4, 1 }
  0x3c   :  { %740 = vmatpush2.bf16.msra.mxu1 %v2960_v37  ;;  %509 = vmatprep.subr.bf16.mxu0 %v2961_v40  ;;  %v289_v12 = vrot.slane %v287_v8, 1  ;;  %v277_v13 = vrot.slane %v275_v10, 1  ;;  %v812_v30 = vrot.slane %v2604_v25, 1  ;;  %v291_v37 = vshrl.u32 %v3574_v5, 16  ;;  %v2988_v38 = vld [vmem:[%s4288_s1 + $0x200] ss:$8 sps:$4 sm:$0xff]  }
  0x3d   :  { %741 = vmatprep.subr.bf16.mxu1 %v2963_v45  ;;  %v815_v3 = vrot.slane %v2605_v63, 1  ;;  %v2993_v8 = vld [vmem:[%s4288_s1 + $0x2f4] ss:$8 sps:$4 sm:$0xff]   ;;  %v2991_v10 = vld [vmem:[%s4288_s1 + $0x2f0] ss:$8 sps:$4 sm:$0xff]  }
  0x3e   :  { %v290_v17 = vsel %vm266_vm10, %v285_v7, %v289_v12  ;;  %v278_v18 = vsel %vm266_vm10, %v273_v9, %v277_v13  ;;  %v3625_v33 = vsel %vm811_vm3, %v812_v30, %v813_v27  ;;  %v301_v50 = vor.u32 %v299_v36, %v289_v12  ;;  %v2994_v12 = vld [vmem:[%s4288_s1 + $0x2e0] ss:$8 sps:$4 sm:$0xff]  }
  0x3f   :  { %510 = vmatpush2.bf16.msra.mxu0 %v2965_v53  ;;  %511 = vmatprep.mubr.bf16.mxu0 %v290_v17  ;;  %v293_v53 = vor.u32 %v291_v37, %v277_v13  ;;  %v817_v9 = vsel %vm811_vm3, %v815_v3, %v816_v6 }
  0x40   :  { %742 = vmatpush2.bf16.msra.mxu1 %v2966_v54  ;;  %988 = vmatprep.subr.bf16.mxu0 %v2969_v56  ;;  %v2982_v56 = vld [vmem:[%s4288_s1 + $0x220] ss:$8 sps:$4 sm:$0xff]  }
  0x42   :  { %512 = vmatmul.mubr.bf16.vlgmr.msra.gmra.mxu0 %v278_v18  ;;  %v211_v40 = vld [vmem:[#allocation2 + $0x18] sm:$0x33] }
  0x43   :  { %744 = vmatmul.mubr.bf16.vlgmr.msra.gmra.mxu1 %v2500_v52  ;;  %989 = vmatpush1.bf16.msra.mxu0 %v2967_v15  ;;  %v178_v41 = vld [vmem:[#allocation2 + $0x18] sm:$0x11]  ;;  %v3638_v44 = vcombine.high %v211_v40, %v211_v40  ;;  %v3640_v45 = vcombine.low %v211_v40, %v211_v40 }
  0x44   :  { %753 = vmatprep.mubr.bf16.mxu1 %v3572_v4  ;;  %990 = vmatprep.subr.bf16.mxu0 %v2972_v19  ;;  %v2539_v46 = vcombine.high %v178_v41, %v178_v41  ;;  %v2538_v48 = vcombine.low %v178_v41, %v178_v41  ;;  %v2996_v4 = vld [vmem:[%s4288_s1 + $0x2e4] ss:$8 sps:$4 sm:$0xff]  }
  0x45   :  { %v303_v52 = vshll.u32 %v3638_v44, 16  ;;  %v295_v54 = vshll.u32 %v3640_v45, 16  ;;  %v310_v55 = vshrl.u32 %v3638_v44, 16  ;;  %v307_v1 = vshrl.u32 %v3640_v45, 16 }
  0x47   :  { %991 = vmatpush1.bf16.msra.mxu0 %v2970_v20  ;;  %v305_v57 = vrot.slane %v303_v52, 1  ;;  %v297_v58 = vrot.slane %v295_v54, 1 }
  0x48   :  { %992 = vmatprep.subr.bf16.mxu0 %v2975_v22 }
  0x49   :  { %v306_v60 = vsel %vm266_vm10, %v301_v50, %v305_v57  ;;  %v298_v61 = vsel %vm266_vm10, %v293_v53, %v297_v58  ;;  %v312_v62 = vor.u32 %v310_v55, %v305_v57  ;;  %v309_v7 = vor.u32 %v307_v1, %v297_v58 }
  0x4a   :  { %521 = vmatprep.mubr.bf16.mxu0 %v306_v60 }
  0x4b   :  { %754 = vmatmul.mubr.bf16.gmra.mxu1 %v3574_v5  ;;  %993 = vmatpush1.bf16.msra.mxu0 %v2973_v29 }
  0x4c   :  { %994 = vmatprep.subr.bf16.mxu0 %v2978_v31  ;;  %763 = vmatprep.mubr.bf16.mxu1 %v2539_v46 }
  0x4d   :  { %522 = vmatmul.mubr.bf16.gmra.mxu0 %v298_v61 }
  0x4e   :  { %531 = vmatprep.mubr.bf16.mxu0 %v312_v62 }
  0x4f   :  { %995 = vmatpush1.bf16.msra.mxu0 %v2976_v34 }
  0x50   :  { %996 = vmatprep.subr.bf16.mxu0 %v2981_v35 }
  0x53   :  { %764 = vmatmul.mubr.bf16.gmra.mxu1 %v2538_v48  ;;  %997 = vmatpush1.bf16.msra.mxu0 %v2979_v42 }
  0x54   :  { %998 = vmatprep.subr.bf16.mxu0 %v2984_v49 }
  0x55   :  { %532 = vmatmul.mubr.bf16.gmra.mxu0 %v309_v7 }
  0x56   :  { %1020 = vmatprep.mubr.bf16.mxu0 %v817_v9 }
  0x57   :  { %999 = vmatpush1.bf16.msra.mxu0 %v2982_v56 }
  0x58   :  { %1000 = vmatprep.subr.bf16.mxu0 %v2987_v59 }
  0x5b   :  { %1001 = vmatpush1.bf16.msra.mxu0 %v2985_v0 }
  0x5c   :  { %1002 = vmatprep.subr.bf16.mxu0 %v2990_v2 }
  0x5f   :  { %1003 = vmatpush1.bf16.msra.mxu0 %v2988_v38 }
  0x60   :  { %1004 = vmatprep.subr.bf16.mxu0 %v2993_v8 }
  0x63   :  { %1005 = vmatpush2.bf16.msra.mxu0 %v2991_v10 }
  0x64   :  { %14 = vsyncpa [#allocation4], 0  ;;  %1006 = vmatprep.subr.bf16.mxu0 %v2996_v4  ;;  %v2999_v13 = vld [vmem:[%s4288_s1 + $0x2d4] ss:$8 sps:$4 sm:$0xff]   ;;  %v2997_v15 = vld [vmem:[%s4288_s1 + $0x2d0] ss:$8 sps:$4 sm:$0xff]  }
  0x65   :  { %v3004_v16 = vld [vmem:[%s4288_s1 + $0x2c4] ss:$8 sps:$4 sm:$0xff]   ;;  %v3002_v17 = vld [vmem:[%s4288_s1 + $0x2c0] ss:$8 sps:$4 sm:$0xff]   ;;  %v3007_v18 = vld [vmem:[%s4288_s1 + $0x2b4] ss:$8 sps:$4 sm:$0xff]  }
  0x66   :  { %v3005_v19 = vld [vmem:[%s4288_s1 + $0x2b0] ss:$8 sps:$4 sm:$0xff]   ;;  %v3010_v20 = vld [vmem:[%s4288_s1 + $0x2a4] ss:$8 sps:$4 sm:$0xff]   ;;  %v3008_v22 = vld [vmem:[%s4288_s1 + $0x2a0] ss:$8 sps:$4 sm:$0xff]  }
  0x67   :  { %1007 = vmatpush2.bf16.msra.mxu0 %v2994_v12  ;;  %v3015_v23 = vld [vmem:[%s4288_s1 + $0x294] ss:$8 sps:$4 sm:$0xff]   ;;  %v3013_v24 = vld [vmem:[%s4288_s1 + $0x290] ss:$8 sps:$4 sm:$0xff]   ;;  %v3018_v25 = vld [vmem:[%s4288_s1 + $0x284] ss:$8 sps:$4 sm:$0xff]  }
  0x68   :  { %1008 = vmatprep.subr.bf16.mxu0 %v2999_v13  ;;  %v3016_v28 = vld [vmem:[%s4288_s1 + $0x280] ss:$8 sps:$4 sm:$0xff]   ;;  %v820_v29 = vrot.slane %v3638_v44, 1  ;;  %v818_v31 = vrot.slane %v3640_v45, 1  ;;  %v3019_v35 = vld [vmem:[%s4290_s3 + $0x70] ss:$8 sps:$4 sm:$0xff]   ;;  %vm4325_vm1 = vmor %vm3499_vm0, %vm3490_vm6 }
  0x69   :  { %v3021_v36 = vld [vmem:[%s4290_s3 + $0x74] ss:$8 sps:$4 sm:$0xff]   ;;  %v3022_v5 = vld [vmem:[%s4290_s3 + $0x60] ss:$8 sps:$4 sm:$0xff]   ;;  %v3025_v37 = vld [vmem:[%s4290_s3 + $0x50] ss:$8 sps:$4 sm:$0xff]  }
  0x6a   :  { %v821_v30 = vsel %vm811_vm3, %v816_v6, %v820_v29  ;;  %v819_v34 = vsel %vm811_vm3, %v813_v27, %v818_v31  ;;  %v3027_v27 = vld [vmem:[%s4290_s3 + $0x54] ss:$8 sps:$4 sm:$0xff]   ;;  %v3028_v40 = vld [vmem:[%s4290_s3 + $0x170] ss:$8 sps:$4 sm:$0xff]   ;;  %v3031_v42 = vld [vmem:[%s4290_s3 + $0x40] ss:$8 sps:$4 sm:$0xff]  }
  0x6b   :  { %1009 = vmatpush2.bf16.msra.mxu0 %v2997_v15  ;;  %v3030_v41 = vld [vmem:[%s4290_s3 + $0x174] ss:$8 sps:$4 sm:$0xff]   ;;  %v3033_v44 = vld [vmem:[%s4290_s3 + $0x44] ss:$8 sps:$4 sm:$0xff]   ;;  %v3034_v45 = vld [vmem:[%s4290_s3 + $0x160] ss:$8 sps:$4 sm:$0xff]  }
  0x6c   :  { %1010 = vmatprep.subr.bf16.mxu0 %v3004_v16  ;;  %1484 = vmatprep.subr.bf16.mxu1 %v3030_v41  ;;  %v3036_v46 = vld [vmem:[%s4290_s3 + $0x164] ss:$8 sps:$4 sm:$0xff]   ;;  %v3037_v48 = vld [vmem:[%s4290_s3 + $0x30] ss:$8 sps:$4 sm:$0xff]   ;;  %v3039_v49 = vld [vmem:[%s4290_s3 + $0x34] ss:$8 sps:$4 sm:$0xff]  }
  0x6d   :  { %1485 = vmatpush1.bf16.msra.mxu1 %v3028_v40  ;;  %v3040_v50 = vld [vmem:[%s4290_s3 + $0x150] ss:$8 sps:$4 sm:$0xff]   ;;  %v3042_v52 = vld [vmem:[%s4290_s3 + $0x154] ss:$8 sps:$4 sm:$0xff]   ;;  %v3043_v53 = vld [vmem:[%s4290_s3 + $0x20] ss:$8 sps:$4 sm:$0xff]  }
  0x6e   :  { %1486 = vmatprep.subr.bf16.mxu1 %v3036_v46  ;;  %v3045_v54 = vld [vmem:[%s4290_s3 + $0x24] ss:$8 sps:$4 sm:$0xff]   ;;  %v3046_v55 = vld [vmem:[%s4290_s3 + $0x140] ss:$8 sps:$4 sm:$0xff]   ;;  %v3049_v57 = vld [vmem:[%s4290_s3 + $0x10] ss:$8 sps:$4 sm:$0xff]  }
  0x6f   :  { %1011 = vmatpush2.bf16.msra.mxu0 %v3002_v17  ;;  %v3048_v56 = vld [vmem:[%s4290_s3 + $0x144] ss:$8 sps:$4 sm:$0xff]   ;;  %v3051_v58 = vld [vmem:[%s4290_s3 + $0x14] ss:$8 sps:$4 sm:$0xff]   ;;  %v3052_v61 = vld [vmem:[%s4290_s3 + $0x130] ss:$8 sps:$4 sm:$0xff]  }
  0x70   :  { %1012 = vmatprep.subr.bf16.mxu0 %v3007_v18  ;;  %v3054_v59 = vld [vmem:[%s4290_s3 + $0x134] ss:$8 sps:$4 sm:$0xff]   ;;  %v3057_v60 = vld [vmem:[%s4290_s3 + $0x4] ss:$8 sps:$4 sm:$0xff]   ;;  %v3055_v62 = vld [vmem:[%s4290_s3] ss:$8 sps:$4 sm:$0xff]  }
  0x71   :  { %1487 = vmatpush1.bf16.msra.mxu1 %v3034_v45  ;;  %v3063_v63 = vld [vmem:[%s4290_s3 + $0xf4] ss:$8 sps:$4 sm:$0xff]   ;;  %v3061_v0 = vld [vmem:[%s4290_s3 + $0xf0] ss:$8 sps:$4 sm:$0xff]   ;;  %v3060_v1 = vld [vmem:[%s4290_s3 + $0x124] ss:$8 sps:$4 sm:$0xff]  }
  0x72   :  { %1488 = vmatprep.subr.bf16.mxu1 %v3042_v52  ;;  %v3069_v2 = vld [vmem:[%s4290_s3 + $0xe4] ss:$8 sps:$4 sm:$0xff]   ;;  %v3058_v3 = vld [vmem:[%s4290_s3 + $0x120] ss:$8 sps:$4 sm:$0xff]   ;;  %v3066_v38 = vld [vmem:[%s4290_s3 + $0x114] ss:$8 sps:$4 sm:$0xff]  }
  0x73   :  { %1013 = vmatpush2.bf16.msra.mxu0 %v3005_v19  ;;  %v3067_v6 = vld [vmem:[%s4290_s3 + $0xe0] ss:$8 sps:$4 sm:$0xff]   ;;  %v3075_v7 = vld [vmem:[%s4290_s3 + $0xd4] ss:$8 sps:$4 sm:$0xff]   ;;  %v3064_v8 = vld [vmem:[%s4290_s3 + $0x110] ss:$8 sps:$4 sm:$0xff]  }
  0x74   :  { %1014 = vmatprep.subr.bf16.mxu0 %v3010_v20  ;;  %v3073_v9 = vld [vmem:[%s4290_s3 + $0xd0] ss:$8 sps:$4 sm:$0xff]   ;;  %v3072_v10 = vld [vmem:[%s4290_s3 + $0x104] ss:$8 sps:$4 sm:$0xff]   ;;  %v3070_v4 = vld [vmem:[%s4290_s3 + $0x100] ss:$8 sps:$4 sm:$0xff]  }
  0x75   :  { %1489 = vmatpush1.bf16.msra.mxu1 %v3040_v50  ;;  %v3081_v12 = vld [vmem:[%s4290_s3 + $0xc4] ss:$8 sps:$4 sm:$0xff]   ;;  %v3079_v13 = vld [vmem:[%s4290_s3 + $0xc0] ss:$8 sps:$4 sm:$0xff]   ;;  %v3078_v15 = vld [vmem:[%s4290_s3 + $0x1f4] ss:$8 sps:$4 sm:$0xff]  }
  0x76   :  { %1490 = vmatprep.subr.bf16.mxu1 %v3048_v56  ;;  %v3087_v16 = vld [vmem:[%s4290_s3 + $0xb4] ss:$8 sps:$4 sm:$0xff]   ;;  %v3076_v17 = vld [vmem:[%s4290_s3 + $0x1f0] ss:$8 sps:$4 sm:$0xff]   ;;  %v3084_v19 = vld [vmem:[%s4290_s3 + $0x1e4] ss:$8 sps:$4 sm:$0xff]  }
  0x77   :  { %1015 = vmatpush2.bf16.msra.mxu0 %v3008_v22  ;;  %v3085_v18 = vld [vmem:[%s4290_s3 + $0xb0] ss:$8 sps:$4 sm:$0xff]   ;;  %v3093_v20 = vld [vmem:[%s4290_s3 + $0xa4] ss:$8 sps:$4 sm:$0xff]   ;;  %v3082_v22 = vld [vmem:[%s4290_s3 + $0x1e0] ss:$8 sps:$4 sm:$0xff]  }
  0x78   :  { %1016 = vmatprep.subr.bf16.mxu0 %v3015_v23  ;;  %v3091_v23 = vld [vmem:[%s4290_s3 + $0xa0] ss:$8 sps:$4 sm:$0xff]   ;;  %v3109_v40 = vld [vmem:[%s4290_s3 + $0x190] ss:$8 sps:$4 sm:$0xff]   ;;  %v3114_v41 = vld [vmem:[%s4290_s3 + $0x184] ss:$8 sps:$4 sm:$0xff]  }
  0x79   :  { %1491 = vmatpush1.bf16.msra.mxu1 %v3046_v55  ;;  %vm2105_vm0 = vcmask 1045504   ;;  %vm2262_vm5 = vcmask 31744  }
  0x7a   :  { %1492 = vmatprep.subr.bf16.mxu1 %v3054_v59 }
  0x7b   :  { %1017 = vmatpush2.bf16.msra.mxu0 %v3013_v24  ;;  %v3090_v24 = vld [vmem:[%s4290_s3 + $0x1d4] ss:$8 sps:$4 sm:$0xff]  }
  0x7c   :  { %1018 = vmatprep.subr.bf16.mxu0 %v3018_v25  ;;  %v3099_v25 = vld [vmem:[%s4290_s3 + $0x94] ss:$8 sps:$4 sm:$0xff]  }
  0x7d   :  { %1493 = vmatpush1.bf16.msra.mxu1 %v3052_v61 }
  0x7e   :  { %1494 = vmatprep.subr.bf16.mxu1 %v3060_v1 }
  0x7f   :  { %1019 = vmatpush2.bf16.msra.mxu0 %v3016_v28  ;;  %v3088_v28 = vld [vmem:[%s4290_s3 + $0x1d0] ss:$8 sps:$4 sm:$0xff]  }
  0x80   :  { %1716 = vmatprep.subr.bf16.mxu0 %v3021_v36  ;;  %v3102_v36 = vld [vmem:[%s4290_s3 + $0x1b4] ss:$8 sps:$4 sm:$0xff]  }
  0x81   :  { %1495 = vmatpush1.bf16.msra.mxu1 %v3058_v3 }
  0x82   :  { %1021 = vmatmul.mubr.bf16.vlgmr.msra.gmra.mxu0 %v3625_v33  ;;  %v3024_v33 = vld [vmem:[%s4290_s3 + $0x64] ss:$8 sps:$4 sm:$0xff]   ;;  %1496 = vmatprep.subr.bf16.mxu1 %v3066_v38 }
  0x83   :  { %1030 = vmatprep.mubr.bf16.mxu0 %v821_v30  ;;  %1717 = vmatpush1.bf16.msra.mxu0 %v3019_v35  ;;  %v3096_v30 = vld [vmem:[%s4290_s3 + $0x1c4] ss:$8 sps:$4 sm:$0xff]   ;;  %v3103_v35 = vld [vmem:[%s4290_s3 + $0x80] ss:$8 sps:$4 sm:$0xff]  }
  0x84   :  { %1718 = vmatprep.subr.bf16.mxu0 %v3024_v33  ;;  %v3100_v33 = vld [vmem:[%s4290_s3 + $0x1b0] ss:$8 sps:$4 sm:$0xff]  }
  0x85   :  { %1497 = vmatpush1.bf16.msra.mxu1 %v3064_v8  ;;  %v1061_v8 = vlaneseq }
  0x86   :  { %1498 = vmatprep.subr.bf16.mxu1 %v3072_v10 }
  0x87   :  { %1719 = vmatpush1.bf16.msra.mxu0 %v3022_v5  ;;  %v3108_v5 = vld [vmem:[%s4290_s3 + $0x1a4] ss:$8 sps:$4 sm:$0xff]  }
  0x88   :  { %1720 = vmatprep.subr.bf16.mxu0 %v3027_v27  ;;  %v3106_v27 = vld [vmem:[%s4290_s3 + $0x1a0] ss:$8 sps:$4 sm:$0xff]  }
  0x89   :  { %1499 = vmatpush1.bf16.msra.mxu1 %v3070_v4  ;;  %v1059_v4 = vld [vmem:[%s4289_s2] sm:$0x3] }
  0x8a   :  { %1031 = vmatmul.mubr.bf16.gmra.mxu0 %v819_v34  ;;  %1500 = vmatprep.subr.bf16.mxu1 %v3078_v15  ;;  %v3094_v34 = vld [vmem:[%s4290_s3 + $0x1c0] ss:$8 sps:$4 sm:$0xff]  }
  0x8b   :  { %1040 = vmatprep.mubr.bf16.mxu0 %v820_v29  ;;  %1721 = vmatpush1.bf16.msra.mxu0 %v3025_v37  ;;  %v3097_v29 = vld [vmem:[%s4290_s3 + $0x90] ss:$8 sps:$4 sm:$0xff]   ;;  %v3111_v37 = vld [vmem:[%s4290_s3 + $0x194] ss:$8 sps:$4 sm:$0xff]  }
  0x8c   :  { %1722 = vmatprep.subr.bf16.mxu0 %v3033_v44  ;;  %v3118_v44 = vld [vmem:[%s4290_s3 + $0x274] ss:$8 sps:$4 sm:$0xff]  }
  0x8d   :  { %1501 = vmatpush2.bf16.msra.mxu1 %v3076_v17 }
  0x8e   :  { %1502 = vmatprep.subr.bf16.mxu1 %v3084_v19 }
  0x8f   :  { %1723 = vmatpush1.bf16.msra.mxu0 %v3031_v42  ;;  %v3112_v42 = vld [vmem:[%s4290_s3 + $0x180] ss:$8 sps:$4 sm:$0xff]  }
  0x90   :  { %1724 = vmatprep.subr.bf16.mxu0 %v3039_v49 }
  0x91   :  { %1503 = vmatpush2.bf16.msra.mxu1 %v3082_v22 }
  0x92   :  { %1041 = vmatmul.mubr.bf16.gmra.mxu0 %v818_v31  ;;  %1504 = vmatprep.subr.bf16.mxu1 %v3090_v24  ;;  %v3105_v31 = vld [vmem:[%s4290_s3 + $0x84] ss:$8 sps:$4 sm:$0xff]  }
  0x93   :  { %1725 = vmatpush1.bf16.msra.mxu0 %v3037_v48 }
  0x94   :  { %1726 = vmatprep.subr.bf16.mxu0 %v3045_v54 }
  0x95   :  { %1505 = vmatpush2.bf16.msra.mxu1 %v3088_v28 }
  0x96   :  { %1506 = vmatprep.subr.bf16.mxu1 %v3096_v30 }
  0x97   :  { %1727 = vmatpush1.bf16.msra.mxu0 %v3043_v53 }
  0x98   :  { %1728 = vmatprep.subr.bf16.mxu0 %v3051_v58 }
  0x99   :  { %1507 = vmatpush2.bf16.msra.mxu1 %v3094_v34 }
  0x9a   :  { %1508 = vmatprep.subr.bf16.mxu1 %v3102_v36 }
  0x9b   :  { %1729 = vmatpush1.bf16.msra.mxu0 %v3049_v57 }
  0x9c   :  { %1730 = vmatprep.subr.bf16.mxu0 %v3057_v60 }
  0x9d   :  { %1509 = vmatpush2.bf16.msra.mxu1 %v3100_v33 }
  0x9e   :  { %1510 = vmatprep.subr.bf16.mxu1 %v3108_v5 }
  0x9f   :  { %1731 = vmatpush1.bf16.msra.mxu0 %v3055_v62 }
  0xa0   :  { %1732 = vmatprep.subr.bf16.mxu0 %v3063_v63 }
  0xa1   :  { %1511 = vmatpush2.bf16.msra.mxu1 %v3106_v27 }
  0xa2   :  { %1512 = vmatprep.subr.bf16.mxu1 %v3111_v37 }
  0xa3   :  { %1733 = vmatpush2.bf16.msra.mxu0 %v3061_v0 }
  0xa4   :  { %1734 = vmatprep.subr.bf16.mxu0 %v3069_v2 }
  0xa5   :  { %1513 = vmatpush2.bf16.msra.mxu1 %v3109_v40 }
  0xa6   :  { %1514 = vmatprep.subr.bf16.mxu1 %v3114_v41 }
  0xa7   :  { %1735 = vmatpush2.bf16.msra.mxu0 %v3067_v6 }
  0xa8   :  { %1736 = vmatprep.subr.bf16.mxu0 %v3075_v7 }
  0xa9   :  { %1515 = vmatpush2.bf16.msra.mxu1 %v3112_v42 }
  0xaa   :  { %1992 = vmatprep.subr.bf16.mxu1 %v3118_v44 }
  0xab   :  { %1737 = vmatpush2.bf16.msra.mxu0 %v3073_v9  ;;  %v1062_v9 = vshrl.u32 %v1061_v8, 7 }
  0xac   :  { %1738 = vmatprep.subr.bf16.mxu0 %v3081_v12 }
  0xad   :  { %v3919_v10 = vsub.s32 0, %v1062_v9  ;;  %v3924_v12 = vsub.s32 1, %v1062_v9 }
  0xaf   :  { %1739 = vmatpush2.bf16.msra.mxu0 %v3079_v13  ;;  %v1064_v15 = vrot.slane %v1059_v4, %v3919_v10  ;;  %v3928_v19 = vrot.slane %v1059_v4, %v3924_v12 }
  0xb0   :  { %1740 = vmatprep.subr.bf16.mxu0 %v3087_v16 }
  0xb3   :  { %1741 = vmatpush2.bf16.msra.mxu0 %v3085_v18 }
  0xb4   :  { %1742 = vmatprep.subr.bf16.mxu0 %v3093_v20 }
  0xb7   :  { %1743 = vmatpush2.bf16.msra.mxu0 %v3091_v23 }
  0xb8   :  { %1744 = vmatprep.subr.bf16.mxu0 %v3099_v25 }
  0xbb   :  { %1745 = vmatpush2.bf16.msra.mxu0 %v3097_v29 }
  0xbc   :  { %1746 = vmatprep.subr.bf16.mxu0 %v3105_v31 }
  0xbf   :  { %1747 = vmatpush2.bf16.msra.mxu0 %v3103_v35 }
 0x102   :  { %v513_v53 = vpop.f32.mrf.mxu0 }
 0x103   :  { %v745_v45 = vpop.f32.mrf.mxu1 }
 0x104   :  { %v515_v55 = vpop.f32.mrf.mxu0  ;;  %v746_v13 = vadd.f32 %v745_v45, %v513_v53 }
 0x105   :  { %v747_v46 = vpop.f32.mrf.mxu1 }
 0x106   :  { %v517_v57 = vpop.f32.mrf.mxu0  ;;  %v748_v17 = vadd.f32 %v747_v46, %v515_v55 }
 0x107   :  { %v749_v48 = vpop.f32.mrf.mxu1 }
 0x108   :  { %v519_v60 = vpop.f32.mrf.mxu0  ;;  %v750_v22 = vadd.f32 %v749_v48, %v517_v57 }
 0x109   :  { %v751_v49 = vpop.f32.mrf.mxu1 }
 0x10a   :  { %v752_v28 = vadd.f32 %v751_v49, %v519_v60 }
 0x10b   :  { %v755_v50 = vpop.f32.mrf.mxu1 }
 0x10d   :  { %v757_v52 = vpop.f32.mrf.mxu1  ;;  %v523_v62 = vpop.f32.mrf.mxu0 }
 0x10e   :  { %v756_v31 = vadd.f32 %v755_v50, %v523_v62 }
 0x10f   :  { %v759_v54 = vpop.f32.mrf.mxu1  ;;  %v525_v0 = vpop.f32.mrf.mxu0 }
 0x110   :  { %v758_v42 = vadd.f32 %v757_v52, %v525_v0 }
 0x111   :  { %v761_v56 = vpop.f32.mrf.mxu1  ;;  %v527_v1 = vpop.f32.mrf.mxu0 }
 0x112   :  { %v760_v45 = vadd.f32 %v759_v54, %v527_v1 }
 0x113   :  { %v765_v58 = vpop.f32.mrf.mxu1  ;;  %v529_v2 = vpop.f32.mrf.mxu0 }
 0x115   :  { %v767_v59 = vpop.f32.mrf.mxu1  ;;  %v533_v3 = vpop.f32.mrf.mxu0 }
 0x116   :  { %v766_v8 = vadd.f32 %v765_v58, %v533_v3  ;;  %v1125_v58 = vld [vmem:[#allocation2] sm:$0x11] }
 0x117   :  { %v769_v61 = vpop.f32.mrf.mxu1  ;;  %v535_v6 = vpop.f32.mrf.mxu0 }
 0x118   :  { %v768_v9 = vadd.f32 %v767_v59, %v535_v6 }
 0x119   :  { %v770_v63 = vpop.f32.mrf.mxu1  ;;  %v537_v38 = vpop.f32.mrf.mxu0 }
 0x11a   :  { %v762_v63 = vadd.f32 %v761_v56, %v529_v2 }
 0x11b   :  { %v538_v7 = vpop.f32.mrf.mxu0 }
 0x142   :  { %v1022_v16 = vpop.f32.mrf.mxu0 }
 0x143   :  { %v1049_v18 = vadd.f32 %v1022_v16, %v746_v13 }
 0x144   :  { %v1024_v20 = vpop.f32.mrf.mxu0 }
 0x145   :  { %v1071_v23 = vadd.f32 %v1064_v15, %v1049_v18  ;;  %v1050_v24 = vadd.f32 %v1024_v20, %v748_v17 }
 0x146   :  { %v1026_v25 = vpop.f32.mrf.mxu0 }
 0x147   :  { %v1072_v29 = vadd.f32 %v3928_v19, %v1050_v24  ;;  %v1051_v30 = vadd.f32 %v1026_v25, %v750_v22  ;;  %v1081_v35 = vmax.f32 %v1071_v23, 0.0 }
 0x148   :  { %v1028_v34 = vpop.f32.mrf.mxu0 }
 0x149   :  { %v1082_v36 = vmax.f32 %v1072_v29, 0.0  ;;  %v1073_v33 = vadd.f32 %v1064_v15, %v1051_v30  ;;  %v1052_v5 = vadd.f32 %v1028_v34, %v752_v28 }
 0x14a   :  { %v1032_v27 = vpop.f32.mrf.mxu0 }
 0x14b   :  { %v2827_v37 = vpack.c.bf16 %v1082_v36, %v1081_v35  ;;  %v1074_v40 = vadd.f32 %v3928_v19, %v1052_v5  ;;  %v1053_v41 = vadd.f32 %v1032_v27, %v756_v31  ;;  %v1083_v48 = vmax.f32 %v1073_v33, 0.0  ;;  %v1173_v27 = vld [vmem:[#allocation2] sm:$0xee] }
 0x14c   :  { %v1034_v44 = vpop.f32.mrf.mxu0 }
 0x14d   :  { %v1102_v46 = vshrl.u32 %v2827_v37, 16  ;;  %v1084_v49 = vmax.f32 %v1074_v40, 0.0  ;;  %v1075_v53 = vadd.f32 %v1064_v15, %v1053_v41  ;;  %v1054_v55 = vadd.f32 %v1034_v44, %v758_v42 }
 0x14e   :  { %v1036_v57 = vpop.f32.mrf.mxu0  ;;  %v1105_v60 = vshll.u32 %v2827_v37, 16 }
 0x14f   :  { %v1104_v50 = vrot.slane %v1102_v46, 7  ;;  %v2828_v61 = vpack.c.bf16 %v1084_v49, %v1083_v48  ;;  %v1055_v62 = vadd.f32 %v1036_v57, %v760_v45  ;;  %v1076_v38 = vadd.f32 %v3928_v19, %v1054_v55 }
 0x150   :  { %v1038_v7 = vpop.f32.mrf.mxu0  ;;  %v1085_v0 = vmax.f32 %v1075_v53, 0.0 }
 0x151   :  { %v1107_v4 = vor.u32 %v1105_v60, %v1104_v50  ;;  %v1110_v52 = vshrl.u32 %v2828_v61, 16  ;;  %v1086_v54 = vmax.f32 %v1076_v38, 0.0  ;;  %v1077_v1 = vadd.f32 %v1064_v15, %v1055_v62 }
 0x152   :  { %v1056_v13 = vadd.f32 %v1038_v7, %v762_v63  ;;  %v1042_v16 = vpop.f32.mrf.mxu0  ;;  %v1113_v2 = vshll.u32 %v2828_v61, 16  ;;  %v1108_v20 = vrot.slane %v1104_v50, 4  ;;  %v1177_v50 = vld [vmem:[#allocation2 + $0x18] sm:$0x33] }
 0x153   :  { %v1122_v17 = vsel %vm4325_vm1, %v1107_v4, %v3522_v39  ;;  %v1112_v56 = vrot.slane %v1110_v52, 7  ;;  %v1057_v18 = vadd.f32 %v1042_v16, %v766_v8  ;;  %v2829_v59 = vpack.c.bf16 %v1086_v54, %v1085_v0 }
 0x154   :  { %1123 = vst [vmem:[#allocation2 + $0x10] sm:$0xff] %v1122_v17  ;;  %v1078_v3 = vadd.f32 %v3928_v19, %v1056_v13  ;;  %v1044_v6 = vpop.f32.mrf.mxu0  ;;  %v1087_v32 = vmax.f32 %v1077_v1, 0.0 }
 0x155   :  { %v1115_v22 = vor.u32 %v1113_v2, %v1112_v56  ;;  %v1117_v23 = vrot.slane %v1112_v56, 4  ;;  %v1079_v24 = vadd.f32 %v1064_v15, %v1057_v18  ;;  %v1058_v25 = vadd.f32 %v1044_v6, %v768_v9 }
 0x156   :  { %v1146_v28 = vshrl.u32 %v2829_v59, 16  ;;  %v1088_v29 = vmax.f32 %v1078_v3, 0.0  ;;  %v1046_v26 = vpop.f32.mrf.mxu0  ;;  %v1149_v31 = vshll.u32 %v2829_v59, 16  ;;  %v3116_v59 = vld [vmem:[%s4290_s3 + $0x270] ss:$8 sps:$4 sm:$0xff]  }
 0x157   :  { %v1116_v39 = vsel %vm3481_vm14, %v1108_v20, %v1115_v22  ;;  %v1126_v30 = vsel %vm3405_vm8, %v1117_v23, %v1125_v58  ;;  %v1080_v34 = vadd.f32 %v3928_v19, %v1058_v25  ;;  %v1089_v37 = vmax.f32 %v1079_v24, 0.0  ;;  %vm4326_vm8 = vmor %vm3543_vm12, %vm3530_vm7  ;;  %v3122_v24 = vld [vmem:[%s4290_s3 + $0x264] ss:$8 sps:$4 sm:$0xff]  }
 0x158   :  { %1127 = vst [vmem:[#allocation2] sm:$0x11] %v1126_v30  ;;  %v1148_v35 = vrot.slane %v1146_v28, 7  ;;  %v2830_v36 = vpack.c.bf16 %v1088_v29, %v1087_v32  ;;  %v2675_v33 = vcombine.low %v1122_v17, %v1116_v39  ;;  %v2676_v5 = vcombine.high %v1122_v17, %v1116_v39  ;;  %v1047_v15 = vpop.f32.mrf.mxu0  ;;  %v3120_v30 = vld [vmem:[%s4290_s3 + $0x260] ss:$8 sps:$4 sm:$0xff]  }
 0x159   :  { %v1090_v40 = vmax.f32 %v1080_v34, 0.0  ;;  %vm4329_vm7 = vcmask 1040384  }
 0x15a   :  { %v1151_v41 = vor.u32 %v1149_v31, %v1148_v35  ;;  %v1154_v42 = vshrl.u32 %v2830_v36, 16  ;;  %1748 = vmatprep.mubr.bf16.mxu0 %v2676_v5  ;;  %v1157_v45 = vshll.u32 %v2830_v36, 16  ;;  %v1152_v48 = vrot.slane %v1148_v35, 4  ;;  %v3126_v35 = vld [vmem:[%s4290_s3 + $0x254] ss:$8 sps:$4 sm:$0xff]   ;;  %vm4330_vm12 = vmmov %vm4329_vm7 }
 0x15b   :  { %v2831_v44 = vpack.c.bf16 %v1090_v40, %v1089_v37  ;;  %1749 = vmatmul.mubr.bf16.vlgmr.msra.gmra.mxu0 %v2675_v33  ;;  %v1275_v62 = vshll.u32 %v2675_v33, 16  ;;  %v1287_v47 = vshll.u32 %v2676_v5, 16  ;;  %v1777_v63 = vld [vmem:[#allocation2 + $0x10] sm:$0xee]  ;;  %v1273_v1 = vshrl.u32 %v2675_v33, 16 }
 0x15c   :  { %v1174_v51 = vsel %vm4326_vm8, %v1151_v41, %v1173_v27  ;;  %v1156_v19 = vrot.slane %v1154_v42, 7  ;;  %v2779_v8 = vcombine.low %v1777_v63, %v1116_v39  ;;  %v2780_v9 = vcombine.high %v1777_v63, %v1116_v39  ;;  %v3124_v42 = vld [vmem:[%s4290_s3 + $0x250] ss:$8 sps:$4 sm:$0xff]   ;;  %v3140_v63 = vld [vmem:[%s4290_s3 + $0x200] ss:$8 sps:$4 sm:$0xff]  }
 0x15d   :  { %1175 = vst [vmem:[#allocation2] sm:$0xee] %v1174_v51  ;;  %v1163_v46 = vshrl.u32 %v2831_v44, 16  ;;  %v1166_v55 = vshll.u32 %v2831_v44, 16  ;;  %v1277_v4 = vrot.slane %v1275_v62, 1  ;;  %v1289_v54 = vrot.slane %v1287_v47, 1 }
 0x15e   :  { %v1159_v49 = vor.u32 %v1157_v45, %v1156_v19  ;;  %v1161_v60 = vrot.slane %v1156_v19, 4  ;;  %v1285_v21 = vshrl.u32 %v2676_v5, 16  ;;  %v1816_v11 = vrot.slane %v2779_v8, 1  ;;  %v3137_v62 = vld [vmem:[%s4290_s3 + $0x210] ss:$8 sps:$4 sm:$0xff]  }
 0x15f   :  { %v1165_v53 = vrot.slane %v1163_v46, 7  ;;  %v1819_v16 = vrot.slane %v2780_v9, 1  ;;  %v1278_v20 = vor.u32 %v1277_v4, %v1273_v1  ;;  %v3130_v46 = vld [vmem:[%s4290_s3 + $0x244] ss:$8 sps:$4 sm:$0xff]   ;;  %v3146_v8 = vld [vmem:[%s4290_s3 + $0x2e0] ss:$8 sps:$4 sm:$0xff]  }
 0x160   :  { %v1160_v57 = vsel %vm3481_vm14, %v1152_v48, %v1159_v49  ;;  %v1290_v2 = vor.u32 %v1289_v54, %v1285_v21  ;;  %v3128_v48 = vld [vmem:[%s4290_s3 + $0x240] ss:$8 sps:$4 sm:$0xff]   ;;  %v3133_v49 = vld [vmem:[%s4290_s3 + $0x234] ss:$8 sps:$4 sm:$0xff]   ;;  %v3142_v47 = vld [vmem:[%s4290_s3 + $0x204] ss:$8 sps:$4 sm:$0xff]  }
 0x161   :  { %v1168_v61 = vor.u32 %v1166_v55, %v1165_v53  ;;  %v3131_v55 = vld [vmem:[%s4290_s3 + $0x230] ss:$8 sps:$4 sm:$0xff]   ;;  %v3151_v9 = vld [vmem:[%s4290_s3 + $0x2d4] ss:$8 sps:$4 sm:$0xff]   ;;  %v3152_v54 = vld [vmem:[%s4290_s3 + $0x2c0] ss:$8 sps:$4 sm:$0xff]  }
 0x162   :  { %v3149_v4 = vld [vmem:[%s4290_s3 + $0x2d0] ss:$8 sps:$4 sm:$0xff]   ;;  %v3157_v1 = vld [vmem:[%s4290_s3 + $0x2b4] ss:$8 sps:$4 sm:$0xff]  }
 0x163   :  { %v1169_v43 = vsel %vm3481_vm14, %v1161_v60, %v1168_v61  ;;  %v3134_v60 = vld [vmem:[%s4290_s3 + $0x220] ss:$8 sps:$4 sm:$0xff]   ;;  %v3139_v61 = vld [vmem:[%s4290_s3 + $0x214] ss:$8 sps:$4 sm:$0xff]   ;;  %v3155_v21 = vld [vmem:[%s4290_s3 + $0x2b0] ss:$8 sps:$4 sm:$0xff]  }
 0x164   :  { %v1178_v38 = vsel %vm170_vm11, %v1169_v43, %v1177_v50  ;;  %v1182_v7 = vld [vmem:[#allocation2] sm:$0xff]  ;;  %v3145_v43 = vld [vmem:[%s4290_s3 + $0x2f4] ss:$8 sps:$4 sm:$0xff]   ;;  %vm4327_vm14 = vcmask 1043456  }
 0x165   :  { %1179 = vst [vmem:[#allocation2 + $0x18] sm:$0x33] %v1178_v38  ;;  %v3959_v52 = vcombine.high %v1182_v7, %v1160_v57  ;;  %v2677_v0 = vcombine.low %v1182_v7, %v1160_v57  ;;  %v3136_v50 = vld [vmem:[%s4290_s3 + $0x224] ss:$8 sps:$4 sm:$0xff]   ;;  %v3143_v38 = vld [vmem:[%s4290_s3 + $0x2f0] ss:$8 sps:$4 sm:$0xff]   ;;  %vm4328_vm6 = vmmov %vm4327_vm14 }
 0x166   :  { %v3148_v7 = vld [vmem:[%s4290_s3 + $0x2e4] ss:$8 sps:$4 sm:$0xff]  }
 0x167   :  { %1758 = vmatprep.mubr.bf16.mxu0 %v3959_v52  ;;  %v1292_v13 = vshll.u32 %v3959_v52, 16  ;;  %v1280_v14 = vshll.u32 %v2677_v0, 16  ;;  %v1820_v17 = vrot.slane %v3959_v52, 1  ;;  %v1817_v56 = vrot.slane %v2677_v0, 1 }
 0x168   :  { %1759 = vmatmul.mubr.bf16.gmra.mxu0 %v2677_v0  ;;  %v1304_v31 = vshrl.u32 %v3959_v52, 16  ;;  %v1296_v36 = vshrl.u32 %v2677_v0, 16  ;;  %v3154_v0 = vld [vmem:[%s4290_s3 + $0x2c4] ss:$8 sps:$4 sm:$0xff]   ;;  %v2167_v52 = vld [vmem:[%s4292_s5 + $0xf0] sm:$0xff] }
 0x169   :  { %v1294_v18 = vrot.slane %v1292_v13, 1  ;;  %v1282_v58 = vrot.slane %v1280_v14, 1  ;;  %v1821_v3 = vsel %vm811_vm3, %v1819_v16, %v1820_v17  ;;  %v3971_v6 = vsel %vm811_vm3, %v1816_v11, %v1817_v56  ;;  %v3160_v13 = vld [vmem:[%s4290_s3 + $0x2a4] ss:$8 sps:$4 sm:$0xff]   ;;  %v3158_v14 = vld [vmem:[%s4290_s3 + $0x2a0] ss:$8 sps:$4 sm:$0xff]  }
 0x16a   :  { %v3163_v11 = vld [vmem:[%s4290_s3 + $0x294] ss:$8 sps:$4 sm:$0xff]   ;;  %v3161_v16 = vld [vmem:[%s4290_s3 + $0x290] ss:$8 sps:$4 sm:$0xff]  }
 0x16b   :  { %v1295_v22 = vsel %vm266_vm10, %v1290_v2, %v1294_v18  ;;  %v1283_v23 = vsel %vm266_vm10, %v1278_v20, %v1282_v58  ;;  %v1306_v5 = vor.u32 %v1304_v31, %v1294_v18  ;;  %v1298_v37 = vor.u32 %v1296_v36, %v1282_v58  ;;  %v3164_v2 = vld [vmem:[%s4290_s3 + $0x280] ss:$8 sps:$4 sm:$0xff]   ;;  %v2168_v58 = vld [vmem:[%s4292_s5 + $0xf8] sm:$0xff]  ;;  %v2143_v36 = vld [vmem:[%s4292_s5 + $0x30] sm:$0xff] }
 0x16c   :  { %1516 = vmatprep.mubr.bf16.mxu1 %v1295_v22  ;;  %v1184_v25 = vld [vmem:[#allocation2 + $0x18] sm:$0x11]  ;;  %2832 = vmatprep.subr.mxu0 %v2168_v58  ;;  %v2165_v22 = vld [vmem:[%s4292_s5 + $0xe0] sm:$0xff] }
 0x16d   :  { %v1217_v28 = vld [vmem:[#allocation2 + $0x18] sm:$0x33]  ;;  %v2714_v32 = vcombine.high %v1184_v25, %v1184_v25  ;;  %1517 = vmatmul.mubr.bf16.vlgmr.msra.gmra.mxu1 %v1283_v23  ;;  %v2713_v29 = vcombine.low %v1184_v25, %v1184_v25  ;;  %v2149_v23 = vld [vmem:[%s4292_s5 + $0x60] sm:$0xff] }
 0x16e   :  { %v3978_v26 = vcombine.high %v1217_v28, %v1217_v28  ;;  %v3980_v39 = vcombine.low %v1217_v28, %v1217_v28  ;;  %1993 = vmatpush1.bf16.msra.mxu1 %v3116_v59  ;;  %v2152_v59 = vld [vmem:[%s4292_s5 + $0x78] sm:$0xff]  ;;  %v2163_v28 = vld [vmem:[%s4292_s5 + $0xd0] sm:$0xff] }
 0x16f   :  { %1768 = vmatprep.mubr.bf16.mxu0 %v2714_v32  ;;  %1994 = vmatprep.subr.bf16.mxu1 %v3122_v24  ;;  %v2164_v24 = vld [vmem:[%s4292_s5 + $0xd8] sm:$0xff]  ;;  %v2147_v32 = vld [vmem:[%s4292_s5 + $0x50] sm:$0xff] }
 0x170   :  { %v1308_v34 = vshll.u32 %v3978_v26, 16  ;;  %v1300_v33 = vshll.u32 %v3980_v39, 16  ;;  %1769 = vmatmul.mubr.bf16.gmra.mxu0 %v2713_v29  ;;  %v1822_v15 = vrot.slane %v3980_v39, 1  ;;  %v1315_v41 = vshrl.u32 %v3978_v26, 16  ;;  %v2148_v25 = vld [vmem:[%s4292_s5 + $0x58] sm:$0xff]  ;;  %v2162_v29 = vld [vmem:[%s4292_s5 + $0xc8] sm:$0xff] }
 0x171   :  { %v1312_v53 = vshrl.u32 %v3980_v39, 16  ;;  %v1824_v18 = vrot.slane %v3978_v26, 1  ;;  %2833 = vmatpush3.msra.mxu0 %v2152_v59  ;;  %v2146_v26 = vld [vmem:[%s4292_s5 + $0x48] sm:$0xff]  ;;  %v2161_v39 = vld [vmem:[%s4292_s5 + $0xc0] sm:$0xff]  ;;  %v2160_v31 = vld [vmem:[%s4292_s5 + $0xb8] sm:$0xff] }
 0x172   :  { %v1310_v27 = vrot.slane %v1308_v34, 1  ;;  %v1302_v40 = vrot.slane %v1300_v33, 1  ;;  %1995 = vmatpush1.bf16.msra.mxu1 %v3120_v30  ;;  %v3999_v44 = vsel %vm811_vm3, %v1817_v56, %v1822_v15  ;;  %v3166_v56 = vld [vmem:[%s4290_s3 + $0x284] ss:$8 sps:$4 sm:$0xff]   ;;  %2834 = vmatprep.subr.mxu0 %v2167_v52  ;;  %v2144_v34 = vld [vmem:[%s4292_s5 + $0x38] sm:$0xff] }
 0x173   :  { %1996 = vmatprep.subr.bf16.mxu1 %v3126_v35  ;;  %v1825_v20 = vsel %vm811_vm3, %v1820_v17, %v1824_v18  ;;  %v2151_v17 = vld [vmem:[%s4292_s5 + $0x70] sm:$0xff]  ;;  %v2145_v30 = vld [vmem:[%s4292_s5 + $0x40] sm:$0xff]  ;;  %v2158_v33 = vld [vmem:[%s4292_s5 + $0xa8] sm:$0xff] }
 0x174   :  { %v1311_v51 = vsel %vm266_vm10, %v1306_v5, %v1310_v27  ;;  %v1303_v19 = vsel %vm266_vm10, %v1298_v37, %v1302_v40  ;;  %v1317_v45 = vor.u32 %v1315_v41, %v1310_v27  ;;  %v1314_v57 = vor.u32 %v1312_v53, %v1302_v40  ;;  %2835 = vmatpush3.msra.mxu0 %v2151_v17  ;;  %v2159_v35 = vld [vmem:[%s4292_s5 + $0xb0] sm:$0xff]  ;;  %v2142_v5 = vld [vmem:[%s4292_s5 + $0x28] sm:$0xff]  ;;  %v2141_v27 = vld [vmem:[%s4292_s5 + $0x20] sm:$0xff] }
 0x175   :  { %1526 = vmatprep.mubr.bf16.mxu1 %v1311_v51  ;;  %v2156_v37 = vld [vmem:[%s4292_s5 + $0x98] sm:$0xff]  ;;  %v2155_v41 = vld [vmem:[%s4292_s5 + $0x90] sm:$0xff]  ;;  %v2138_v51 = vld [vmem:[%s4292_s5 + $0x8] sm:$0xff] }
 0x176   :  { %1527 = vmatmul.mubr.bf16.gmra.mxu1 %v1303_v19  ;;  %v2140_v40 = vld [vmem:[%s4292_s5 + $0x18] sm:$0xff]  ;;  %v2153_v19 = vld [vmem:[%s4292_s5 + $0x80] sm:$0xff] }
 0x177   :  { %1997 = vmatpush1.bf16.msra.mxu1 %v3124_v42  ;;  %1536 = vmatprep.mubr.bf16.mxu1 %v1317_v45  ;;  %v2139_v42 = vld [vmem:[%s4292_s5 + $0x10] sm:$0xff]  ;;  %v2137_v45 = vld [vmem:[%s4292_s5] sm:$0xff] }
 0x178   :  { %1998 = vmatprep.subr.bf16.mxu1 %v3130_v46  ;;  %v2247_v46 = vld [vmem:[%s4294_s7] sm:$0xff] }
 0x17b   :  { %1999 = vmatpush1.bf16.msra.mxu1 %v3128_v48  ;;  %v2261_v48 = vcombine.high %v2247_v46, %v2247_v46 }
 0x17c   :  { %2000 = vmatprep.subr.bf16.mxu1 %v3133_v49 }
 0x17e   :  { %1537 = vmatmul.mubr.bf16.gmra.mxu1 %v1314_v57 }
 0x17f   :  { %2001 = vmatpush1.bf16.msra.mxu1 %v3131_v55  ;;  %2024 = vmatprep.mubr.bf16.mxu1 %v1821_v3  ;;  %v2166_v3 = vld [vmem:[%s4292_s5 + $0xe8] sm:$0xff] }
 0x180   :  { %2002 = vmatprep.subr.bf16.mxu1 %v3136_v50  ;;  %2836 = vmatprep.subr.mxu0 %v2166_v3 }
 0x183   :  { %2003 = vmatpush1.bf16.msra.mxu1 %v3134_v60 }
 0x184   :  { %2004 = vmatprep.subr.bf16.mxu1 %v3139_v61 }
 0x187   :  { %2005 = vmatpush1.bf16.msra.mxu1 %v3137_v62 }
 0x188   :  { %2006 = vmatprep.subr.bf16.mxu1 %v3142_v47 }
 0x18b   :  { %2007 = vmatpush1.bf16.msra.mxu1 %v3140_v63 }
 0x18c   :  { %2008 = vmatprep.subr.bf16.mxu1 %v3145_v43 }
 0x18f   :  { %2009 = vmatpush2.bf16.msra.mxu1 %v3143_v38 }
 0x190   :  { %2010 = vmatprep.subr.bf16.mxu1 %v3148_v7 }
 0x193   :  { %2011 = vmatpush2.bf16.msra.mxu1 %v3146_v8 }
 0x194   :  { %2012 = vmatprep.subr.bf16.mxu1 %v3151_v9 }
 0x197   :  { %2013 = vmatpush2.bf16.msra.mxu1 %v3149_v4 }
 0x198   :  { %2014 = vmatprep.subr.bf16.mxu1 %v3154_v0 }
 0x19b   :  { %2015 = vmatpush2.bf16.msra.mxu1 %v3152_v54 }
 0x19c   :  { %2016 = vmatprep.subr.bf16.mxu1 %v3157_v1 }
 0x19f   :  { %2017 = vmatpush2.bf16.msra.mxu1 %v3155_v21 }
 0x1a0   :  { %2018 = vmatprep.subr.bf16.mxu1 %v3160_v13 }
 0x1a3   :  { %2019 = vmatpush2.bf16.msra.mxu1 %v3158_v14 }
 0x1a4   :  { %2020 = vmatprep.subr.bf16.mxu1 %v3163_v11 }
 0x1a7   :  { %2021 = vmatpush2.bf16.msra.mxu1 %v3161_v16 }
 0x1a8   :  { %2022 = vmatprep.subr.bf16.mxu1 %v3166_v56 }
 0x1ab   :  { %2023 = vmatpush2.bf16.msra.mxu1 %v3164_v2 }
 0x1ac   :  { %2814 = vmatprep.subr.msk.mxu1 %vm4327_vm14, %v2261_v48 }
 0x1ae   :  { %2025 = vmatmul.mubr.bf16.vlgmr.msra.gmra.mxu1 %v3971_v6  ;;  %v2150_v6 = vld [vmem:[%s4292_s5 + $0x68] sm:$0xff] }
 0x1af   :  { %2034 = vmatprep.mubr.bf16.mxu1 %v1825_v20  ;;  %2837 = vmatpush3.msra.mxu0 %v2150_v6 }
 0x1b0   :  { %2838 = vmatprep.subr.mxu0 %v2165_v22  ;;  %2815 = vmatpush1.msk.msra.mxu1 %vm4328_vm6, %v2247_v46 }
 0x1b1   :  { %2839 = vmatpush3.msra.mxu0 %v2149_v23 }
 0x1b2   :  { %2840 = vmatprep.subr.mxu0 %v2164_v24  ;;  %v2063_v24 = vld [vmem:[%s4291_s4] sm:$0x3] }
 0x1b3   :  { %2841 = vmatpush3.msra.mxu0 %v2148_v25 }
 0x1b4   :  { %2842 = vmatprep.subr.mxu0 %v2163_v28 }
 0x1b5   :  { %2843 = vmatpush3.msra.mxu0 %v2147_v32 }
 0x1b6   :  { %2035 = vmatmul.mubr.bf16.gmra.mxu1 %v3999_v44  ;;  %2844 = vmatprep.subr.mxu0 %v2162_v29  ;;  %v2154_v44 = vld [vmem:[%s4292_s5 + $0x88] sm:$0xff] }
 0x1b7   :  { %2044 = vmatprep.mubr.bf16.mxu1 %v1824_v18  ;;  %2845 = vmatpush3.msra.mxu0 %v2146_v26  ;;  %v2068_v26 = vrot.slane %v2063_v24, %v3919_v10 }
 0x1b8   :  { %2846 = vmatprep.subr.mxu0 %v2161_v39 }
 0x1b9   :  { %2847 = vmatpush3.msra.mxu0 %v2145_v30  ;;  %v2072_v30 = vrot.slane %v2063_v24, %v3924_v12 }
 0x1ba   :  { %2848 = vmatprep.subr.mxu0 %v2160_v31 }
 0x1bb   :  { %2849 = vmatpush3.msra.mxu0 %v2144_v34 }
 0x1bc   :  { %2850 = vmatprep.subr.mxu0 %v2159_v35 }
 0x1bd   :  { %2851 = vmatpush3.msra.mxu0 %v2143_v36 }
 0x1be   :  { %2045 = vmatmul.mubr.bf16.gmra.mxu1 %v1822_v15  ;;  %v2157_v15 = vld [vmem:[%s4292_s5 + $0xa0] sm:$0xff]  ;;  %2852 = vmatprep.subr.mxu0 %v2158_v33 }
 0x1bf   :  { %2853 = vmatpush3.msra.mxu0 %v2142_v5 }
 0x1c0   :  { %2854 = vmatprep.subr.mxu0 %v2157_v15 }
 0x1c1   :  { %2855 = vmatpush3.msra.mxu0 %v2141_v27 }
 0x1c2   :  { %2856 = vmatprep.subr.mxu0 %v2156_v37 }
 0x1c3   :  { %2857 = vmatpush3.msra.mxu0 %v2140_v40 }
 0x1c4   :  { %2858 = vmatprep.subr.mxu0 %v2155_v41 }
 0x1c5   :  { %2859 = vmatpush3.msra.mxu0 %v2139_v42 }
 0x1c6   :  { %2860 = vmatprep.subr.mxu0 %v2154_v44 }
 0x1c7   :  { %2861 = vmatpush3.msra.mxu0 %v2138_v51 }
 0x1c8   :  { %2862 = vmatprep.subr.mxu0 %v2153_v19 }
 0x1c9   :  { %2863 = vmatpush3.msra.mxu0 %v2137_v45 }
 0x21b   :  { %v1750_v49 = vpop.f32.mrf.mxu0 }
 0x21d   :  { %v1752_v53 = vpop.f32.mrf.mxu0 }
 0x21f   :  { %v1754_v55 = vpop.f32.mrf.mxu0 }
 0x221   :  { %v1756_v57 = vpop.f32.mrf.mxu0 }
 0x228   :  { %v1760_v50 = vpop.f32.mrf.mxu0 }
 0x22a   :  { %v1762_v60 = vpop.f32.mrf.mxu0 }
 0x22c   :  { %v1764_v61 = vpop.f32.mrf.mxu0 }
 0x22d   :  { %v1518_v62 = vpop.f32.mrf.mxu1 }
 0x22e   :  { %v1751_v47 = vadd.f32 %v1750_v49, %v1518_v62  ;;  %v1766_v63 = vpop.f32.mrf.mxu0 }
 0x22f   :  { %v1520_v43 = vpop.f32.mrf.mxu1 }
 0x230   :  { %v1753_v38 = vadd.f32 %v1752_v53, %v1520_v43  ;;  %v1770_v7 = vpop.f32.mrf.mxu0 }
 0x231   :  { %v1522_v8 = vpop.f32.mrf.mxu1 }
 0x232   :  { %v1755_v9 = vadd.f32 %v1754_v55, %v1522_v8  ;;  %v1772_v4 = vpop.f32.mrf.mxu0 }
 0x233   :  { %v1524_v0 = vpop.f32.mrf.mxu1 }
 0x234   :  { %v1757_v54 = vadd.f32 %v1756_v57, %v1524_v0  ;;  %v1774_v1 = vpop.f32.mrf.mxu0 }
 0x236   :  { %v1528_v21 = vpop.f32.mrf.mxu1  ;;  %v1775_v14 = vpop.f32.mrf.mxu0 }
 0x237   :  { %v1761_v13 = vadd.f32 %v1760_v50, %v1528_v21 }
 0x238   :  { %v1530_v11 = vpop.f32.mrf.mxu1 }
 0x239   :  { %v1763_v16 = vadd.f32 %v1762_v60, %v1530_v11 }
 0x23a   :  { %v1532_v56 = vpop.f32.mrf.mxu1 }
 0x23b   :  { %v1765_v2 = vadd.f32 %v1764_v61, %v1532_v56 }
 0x23c   :  { %v1534_v18 = vpop.f32.mrf.mxu1 }
 0x23d   :  { %v1767_v20 = vadd.f32 %v1766_v63, %v1534_v18 }
 0x23e   :  { %v1538_v58 = vpop.f32.mrf.mxu1 }
 0x23f   :  { %v1771_v59 = vadd.f32 %v1770_v7, %v1538_v58 }
 0x240   :  { %v1540_v52 = vpop.f32.mrf.mxu1 }
 0x241   :  { %v1773_v46 = vadd.f32 %v1772_v4, %v1540_v52 }
 0x242   :  { %v1542_v17 = vpop.f32.mrf.mxu1 }
 0x244   :  { %v1543_v3 = vpop.f32.mrf.mxu1 }
 0x26e   :  { %v2026_v6 = vpop.f32.mrf.mxu1 }
 0x26f   :  { %v2053_v29 = vadd.f32 %v2026_v6, %v1751_v47 }
 0x270   :  { %v2028_v22 = vpop.f32.mrf.mxu1 }
 0x271   :  { %v2054_v39 = vadd.f32 %v2028_v22, %v1753_v38  ;;  %v4200_v33 = vadd.f32 %v2068_v26, %v2053_v29 }
 0x272   :  { %v2030_v23 = vpop.f32.mrf.mxu1 }
 0x273   :  { %v2055_v25 = vadd.f32 %v2030_v23, %v1755_v9  ;;  %v4202_v5 = vadd.f32 %v2072_v30, %v2054_v39 }
 0x274   :  { %v2032_v28 = vpop.f32.mrf.mxu1 }
 0x275   :  { %v2056_v32 = vadd.f32 %v2032_v28, %v1757_v54  ;;  %v4196_v34 = vadd.f32 %v2068_v26, %v2055_v25 }
 0x276   :  { %v2036_v31 = vpop.f32.mrf.mxu1 }
 0x277   :  { %v4198_v35 = vadd.f32 %v2072_v30, %v2056_v32  ;;  %v2057_v27 = vadd.f32 %v2036_v31, %v1761_v13  ;;  %v2085_v37 = vadd.f32 %v4196_v34, %v4200_v33 }
 0x278   :  { %v2038_v36 = vpop.f32.mrf.mxu1 }
 0x279   :  { %v2092_v40 = vadd.f32 %v4198_v35, %v4202_v5  ;;  %v2058_v44 = vadd.f32 %v2038_v36, %v1763_v16  ;;  %v4210_v48 = vadd.f32 %v2068_v26, %v2057_v27  ;;  %v2086_v55 = vrot.slane %v2085_v37, 4 }
 0x27a   :  { %v2040_v15 = vpop.f32.mrf.mxu1  ;;  %v3198_v27 = vmov 0.0  }
 0x27b   :  { %v2059_v41 = vadd.f32 %v2040_v15, %v1765_v2  ;;  %v2093_v57 = vrot.slane %v2092_v40, 4  ;;  %v4214_v60 = vadd.f32 %v2072_v30, %v2058_v44  ;;  %v2106_v43 = vrot.slane %v4210_v48, 2  ;;  %2335 = vmatprep.mubr.f32.mxu1 %v3198_v27 }
 0x27c   :  { %v2042_v42 = vpop.f32.mrf.mxu1  ;;  %v2087_v9 = vadd.f32 %v2086_v55, %v2085_v37 }
 0x27d   :  { %v2060_v51 = vadd.f32 %v2042_v42, %v1767_v20  ;;  %v4208_v19 = vadd.f32 %v2068_v26, %v2059_v41  ;;  %v2094_v4 = vadd.f32 %v2093_v57, %v2092_v40  ;;  %v2109_v54 = vrot.slane %v4214_v60, 2  ;;  %v2813_v40 = vld [vmem:[%s4293_s6] ss:$0 sm:$0xff] }
 0x27e   :  { %v2046_v45 = vpop.f32.mrf.mxu1  ;;  %v2088_v20 = vrot.slane %v2087_v9, 2 }
 0x27f   :  { %v4212_v49 = vadd.f32 %v2072_v30, %v2060_v51  ;;  %v2061_v53 = vadd.f32 %v2046_v45, %v1771_v59  ;;  %v2107_v61 = vrot.slane %v4208_v19, 2  ;;  %v2095_v56 = vrot.slane %v2094_v4, 2  ;;  %v2248_v45 = vld [vmem:[%s4295_s8] sm:$0x3] }
 0x280   :  { %v2048_v50 = vpop.f32.mrf.mxu1  ;;  %v2089_v6 = vadd.f32 %v2088_v20, %v2087_v9  ;;  %v2366_v20 = vld [vmem:[%s4287_s0] sm:$0xff] }
 0x281   :  { %v4217_v62 = vadd.f32 %v2068_v26, %v2061_v53  ;;  %v2062_v47 = vadd.f32 %v2048_v50, %v1773_v46  ;;  %v2110_v38 = vrot.slane %v4212_v49, 2  ;;  %v2108_v1 = vsel %vm2105_vm0, %v2106_v43, %v2107_v61 }
 0x282   :  { %v2050_v63 = vpop.f32.mrf.mxu1  ;;  %v2096_v17 = vadd.f32 %v2095_v56, %v2094_v4  ;;  %v2090_v32 = vrot.slane %v2089_v6, 1  ;;  %v2253_v46 = vrot.slane %v2248_v45, %v3919_v10  ;;  %v2257_v53 = vrot.slane %v2248_v45, %v3924_v12  ;;  %v2819_v4 = vld [vmem:[%s4287_s0 + $0x20] sm:$0xff] }
 0x283   :  { %v2112_v7 = vrot.slane %v4217_v62, 2  ;;  %v4222_v8 = vadd.f32 %v2072_v30, %v2062_v47  ;;  %v2111_v11 = vsel %vm2105_vm0, %v2109_v54, %v2110_v38  ;;  %v2820_v54 = vld [vmem:[%s4287_s0 + $0x28] sm:$0xff] }
 0x284   :  { %v2051_v0 = vpop.f32.mrf.mxu1  ;;  %v2097_v24 = vrot.slane %v2096_v17, 1  ;;  %v2091_v31 = vadd.f32 %v2090_v32, %v2089_v6 }
 0x285   :  { %v2113_v21 = vsel %vm2105_vm0, %v2107_v61, %v2112_v7  ;;  %v2114_v13 = vrot.slane %v4222_v8, 2  ;;  %v2821_v0 = vld [vmem:[%s4287_s0 + $0x30] sm:$0xff] }
 0x286   :  { %v2120_v14 = vadd.f32 %v2113_v21, %v2108_v1  ;;  %v2098_v39 = vadd.f32 %v2097_v24, %v2096_v17  ;;  %v2822_v1 = vld [vmem:[%s4287_s0 + $0x38] sm:$0xff]  ;;  %v2401_v21 = vrot.slane %v2819_v4, 6 }
 0x287   :  { %v2115_v16 = vsel %vm2105_vm0, %v2110_v38, %v2114_v13  ;;  %v2403_v13 = vrot.slane %v2821_v0, 6 }
 0x288   :  { %v2121_v2 = vrot.slane %v2120_v14, 4  ;;  %v2127_v18 = vadd.f32 %v2115_v16, %v2111_v11  ;;  %v2402_v11 = vrot.slane %v2820_v54, 6  ;;  %v2405_v16 = vrot.slane %v2822_v1, 6 }
 0x28a   :  { %v2122_v58 = vadd.f32 %v2121_v2, %v2120_v14  ;;  %v2128_v59 = vrot.slane %v2127_v18, 4 }
 0x28c   :  { %v2123_v52 = vrot.slane %v2122_v58, 2  ;;  %v2129_v3 = vadd.f32 %v2128_v59, %v2127_v18  ;;  %v2404_v59 = vsel %vm166_vm4, %v2401_v21, %v2403_v13 }
 0x28e   :  { %v2130_v22 = vrot.slane %v2129_v3, 2  ;;  %v2124_v23 = vadd.f32 %v2123_v52, %v2122_v58  ;;  %v2368_v58 = vld [vmem:[%s4287_s0 + $0x10] sm:$0xff] }
 0x290   :  { %v2131_v25 = vadd.f32 %v2130_v22, %v2129_v3  ;;  %v2125_v28 = vrot.slane %v2124_v23, 1 }
 0x292   :  { %v2132_v29 = vrot.slane %v2131_v25, 1  ;;  %v2126_v26 = vadd.f32 %v2125_v28, %v2124_v23 }
 0x294   :  { %v2133_v30 = vadd.f32 %v2132_v29, %v2131_v25  ;;  %v2135_v15 = vsel %vm4330_vm12, %v2091_v31, %v2126_v26  ;;  %v2406_v25 = vsel %vm166_vm4, %v2402_v11, %v2405_v16 }
 0x296   :  { %v2136_v36 = vsel %vm4329_vm7, %v2098_v39, %v2133_v30 }
 0x297   :  { %2240 = vmatprep.mubr.f32.mxu0 %v2136_v36 }
 0x298   :  { %2241 = vmatmul.mubr.f32.vlgmr.msra.gmra.mxu0 %v2135_v15 }
 0x358   :  { %v2864_v37 = vpop.f32.mrf.mxu0 }
 0x35a   :  { %v2865_v41 = vpop.f32.mrf.mxu0 }
 0x35b   :  { %v2866_v42 = vadd.f32 %v2865_v41, %v2864_v37 }
 0x35d   :  { %v2243_v44 = vadd.f32 %v2866_v42, %v2813_v40 }
 0x35f   :  { %v2246_v51 = vmax.f32 %v2243_v44, 0.0 }
 0x361   :  { %2816 = vmatmul.mubr.msk.f32.vlgmr.msra.gmra.mxu1 %vm2262_vm5, %v2246_v51 }
 0x421   :  { %v2337_v55 = vpop.f32.mrf.mxu1 }
 0x422   :  { %v2338_v57 = vadd.f32 %v2337_v55, %v2253_v46 }
 0x423   :  { %v2339_v50 = vpop.f32.mrf.mxu1 }
 0x424   :  { %v2817_v61 = vmul.f32 -1.442695, %v2338_v57  ;;  %v2340_v47 = vadd.f32 %v2339_v50, %v2257_v53 }
 0x426   :  { %3168 = vpow2.f32 %v2817_v61  ;;  %v2818_v63 = vmul.f32 -1.442695, %v2340_v47 }
 0x428   :  { %3170 = vpow2.f32 %v2818_v63 }
 0x433   :  { %v3169_v43 = vpop.eup %3168 }
 0x434   :  { %v2348_v38 = vadd.f32 1.0, %v3169_v43 }
 0x435   :  { %v3171_v7 = vpop.eup %3170 }
 0x436   :  { %3172 = vrcp.f32 %v2348_v38  ;;  %v2349_v9 = vadd.f32 1.0, %v3171_v7 }
 0x438   :  { %3174 = vrcp.f32 %v2349_v9 }
 0x443   :  { %v3173_v14 = vpop.eup %3172 }
 0x444   :  { %v2357_v56 = vrot.slane %v3173_v14, %v3919_v10  ;;  %v2381_v2 = vrot.slane %v3173_v14, %v3924_v12 }
 0x445   :  { %v3175_v18 = vpop.eup %3174 }
 0x446   :  { %v2362_v52 = vmul.f32 %v2357_v56, %v4200_v33  ;;  %v2364_v17 = vmul.f32 %v2357_v56, %v4196_v34  ;;  %v2386_v3 = vmul.f32 %v2381_v2, %v4210_v48  ;;  %v2388_v6 = vmul.f32 %v2381_v2, %v4208_v19  ;;  %v2367_v34 = vld [vmem:[%s4287_s0 + $0x8] sm:$0xff]  ;;  %v2369_v33 = vld [vmem:[%s4287_s0 + $0x18] sm:$0xff]  ;;  %s3199_s0 = smov [#allocation3]  }
 0x447   :  { %v2390_v22 = vmul.f32 %v2381_v2, %v4217_v62  ;;  %v2361_v23 = vrot.slane %v3175_v18, %v3919_v10  ;;  %v2385_v24 = vrot.slane %v3175_v18, %v3924_v12  ;;  %s2449_s1 = sshll.u32 %s3199_s0, 4  ;;  %s2450_s1 = int_to_ptr.vmem [resolvable:$true] %s2449_s1 }
 0x448   :  { %v2370_v28 = vadd.f32 %v2366_v20, %v2362_v52  ;;  %v2372_v32 = vadd.f32 %v2368_v58, %v2364_v17  ;;  %v2413_v29 = vadd.f32 %v2401_v21, %v2386_v3  ;;  %v2415_v26 = vadd.f32 %v2404_v59, %v2388_v6  ;;  %s3176_s30 = scalar_lea.vmem %s2450_s1, 1024  ;;  %p3181_p1 = scmp.lt.s32.totalorder %s2450_s1, %s2450_s1 }
 0x449   :  { %v2417_v19 = vadd.f32 %v2403_v13, %v2390_v22  ;;  %v2363_v48 = vmul.f32 %v2361_v23, %v4202_v5  ;;  %v2365_v10 = vmul.f32 %v2361_v23, %v4198_v35  ;;  %v2387_v12 = vmul.f32 %v2385_v24, %v4214_v60  ;;  %p3177_p0 = scmp.ne.s32.totalorder %s2450_s1, %s3176_s30  ;;  %p3182_p2 = scmp.lt.s32.totalorder %s3176_s30, %s3176_s30 }
 0x44a   :  { %2374 = vst [vmem:[#allocation3] sm:$0xff] %v2370_v28  ;;  %2376 = vst [vmem:[#allocation3 + $0x10] sm:$0xff] %v2372_v32  ;;  %v2425_v62 = vrot.slane %v2413_v29, 2  ;;  %v2426_v39 = vrot.slane %v2415_v26, 2  ;;  %v2389_v30 = vmul.f32 %v2385_v24, %v4212_v49  ;;  %v2391_v31 = vmul.f32 %v2385_v24, %v4222_v8 }
 0x44b   :  { %v2431_v36 = vrot.slane %v2417_v19, 2  ;;  %v2371_v15 = vadd.f32 %v2367_v34, %v2363_v48  ;;  %v2373_v27 = vadd.f32 %v2369_v33, %v2365_v10  ;;  %v2414_v37 = vadd.f32 %v2402_v11, %v2387_v12  ;;  %p3183_p3 = por %p3182_p2, %p3181_p1 }
 0x44c   :  { %v2427_v5 = vsel %vm2105_vm0, %v2425_v62, %v2426_v39  ;;  %v2416_v40 = vadd.f32 %v2406_v25, %v2389_v30  ;;  %v2418_v35 = vadd.f32 %v2405_v16, %v2391_v31 }
 0x44d   :  { %v2432_v60 = vsel %vm2105_vm0, %v2426_v39, %v2431_v36  ;;  %2440 = vst [vmem:[#allocation3 + $0x20] sm:$0xff] %v2427_v5  ;;  %2375 = vst [vmem:[#allocation3 + $0x8] sm:$0xff] %v2371_v15  ;;  %v2428_v41 = vrot.slane %v2414_v37, 2  ;;  %p3184_p4 = pnand %p3183_p3, %p3177_p0 }
 0x44e   :  { %2377 = vst [vmem:[#allocation3 + $0x18] sm:$0xff] %v2373_v27  ;;  %2442 = vst [vmem:[#allocation3 + $0x30] sm:$0xff] %v2432_v60  ;;  %v2429_v49 = vrot.slane %v2416_v40, 2  ;;  %v2433_v42 = vrot.slane %v2418_v35, 2 }
 0x450   :  { %v2430_v8 = vsel %vm2105_vm0, %v2428_v41, %v2429_v49  ;;  %v2434_v44 = vsel %vm2105_vm0, %v2429_v49, %v2433_v42 }
 0x451   :  { %2441 = vst [vmem:[#allocation3 + $0x28] sm:$0xff] %v2430_v8  ;;  %2443 = vst [vmem:[#allocation3 + $0x38] sm:$0xff] %v2434_v44 }
 0x452   :  { %3187 = shalt.err (!%p3184_p4)
}
 0x453   :  { %s3200_s10 = smov 256   ;;  %s3201_s11 = smov 16  }
 0x454   :  { %2455 = dma.vmem_to_hbm [thread:$0]  %s2450_s1, 1024, %s4296_s9, [#allocation4], %s3200_s10, %s3200_s10, %s3201_s11  }
 0x455   :  { %3196 = dma.done.wait [#allocation4], 1024  }
 0x456   :  { %3197 = vsyncadd [#allocation4], 4294966272 }
 0x457   :  { %2459 = vsyncpa [#allocation4], 1 }

</bundles_post_ra>
